<compile_context>
chip_gen: v6e
topology: v6e:2x2x1
jax: 0.10.0
libtpu: 0.0.40
codegen_flags: <defaults>
</compile_context>

<pallas_src>
import jax
import jax.numpy as jnp
import numpy as np
from jax import lax
from jax.experimental import pallas as pl
from jax.experimental.pallas import tpu as pltpu

EPS = 1e-10
_HI = lax.Precision.HIGHEST  # pure-JAX reference + f32-path cLN statistics


# ----------------------------- chip detection --------------------------------
def _device_kind():
    try:
        return jax.devices()[0].device_kind.lower()
    except Exception:
        return ""


def _pick_compute_dtype(kind=None):
    """bf16 activations on bf16-native VPUs (v6e/v7x); f32 elsewhere (v5e...)."""
    kind = _device_kind() if kind is None else kind
    if "v6" in kind or "v7" in kind:
        return jnp.bfloat16
    return jnp.float32


def _round_up(n, m):
    return ((n + m - 1) // m) * m


# ------------------------------- kernel body ----------------------------------
def make_kernel(kernel_size, dilation, seg_len, c_in, hidden, compute_dtype):
    K, D, L, H = kernel_size, dilation, seg_len, hidden
    cdt = jnp.dtype(compute_dtype)
    # Keep the channel-reduction matmuls exact on the f32 path (v5e); with
    # bf16 inputs the precision flag is moot and costs nothing.
    stat_prec = _HI if cdt == jnp.dtype(jnp.float32) else None

    # Depthwise taps whose causal shift can reach a valid output (s < L);
    # taps shifted past the segment start only contribute zeros.
    dw_taps = tuple((k, (K - 1 - k) * D) for k in range(K - 1)
                    if (K - 1 - k) * D < L)
    ps_shifts = []
    s = 1
    while s < L:
        ps_shifts.append(s)
        s *= 2
    ps_shifts = tuple(ps_shifts)
    all_shifts = tuple(sorted({sh for _, sh in dw_taps} | set(ps_shifts)))

    def kernel(x_ref, tau_ref, w1_ref, hp_ref, wd_ref, wrs_ref, brs_ref,
               res_ref, skip_ref):
        x = x_ref[...]            # (C_in_p, Lb) f32, Lb = batch_block * Lp
        tau = tau_ref[...]        # (1, Lb) int32 time-in-segment
        w1 = w1_ref[...]          # (H, C_in_p)            compute dtype
        hp = hp_ref[...]          # (H, 8) f32: [b1 g1 be1 bd g2 be2 a1 a2]
        wd = wd_ref[...]          # (H, K)                 compute dtype
        wrs = wrs_ref[...]        # (C_in_p + C_skip_p, H) compute dtype
        brs = brs_ref[...]        # (C_in_p + C_skip_p, 1) f32

        b1, g1, be1 = hp[:, 0:1], hp[:, 1:2], hp[:, 2:3]
        bd, g2, be2 = hp[:, 3:4], hp[:, 4:5], hp[:, 5:6]
        a1, a2 = hp[:, 6:7], hp[:, 7:8]

        # Hoisted causal masks: one compare per distinct shift, shared by the
        # depthwise taps and both prefix sums (JAX does not CSE these).
        masks = {sh: tau >= sh for sh in all_shifts}

        # 1/(H*(t+1)) derived in-kernel (one fewer pipelined input stream).
        inv_count = 1.0 / (jnp.float32(H) * (tau.astype(jnp.float32) + 1.0))

        ones_h = jnp.ones((1, H), cdt)   # MXU channel-reduction row

        def segment_cumsum2(v):
            # Fused (2, Lb) Hillis-Steele prefix sum (cum_sum & cum_pow share
            # the same vregs), restarting at each segment start via the mask.
            # TODO(synk): optionally relayout to (2*batch_block, Lp) to fill
            # all 8 sublanes if the bundle dump shows the roll chain binding.
            for sh in ps_shifts:
                v = v + jnp.where(masks[sh],
                                  pltpu.roll(v, shift=sh, axis=1), 0.0)
            return v

        def cln(z, gain, bias):
            # Channel reductions on the MXU (ones-row matmuls); statistics and
            # the normalization stay in f32.
            zc = z.astype(cdt)
            s1 = jnp.dot(ones_h, zc, preferred_element_type=jnp.float32,
                         precision=stat_prec)
            s2 = jnp.dot(ones_h, zc * zc, preferred_element_type=jnp.float32,
                         precision=stat_prec)
            cum = segment_cumsum2(jnp.concatenate([s1, s2], axis=0))  # (2, Lb)
            cum_mean = cum[0:1, :] * inv_count
            cum_var = cum[1:2, :] * inv_count - cum_mean * cum_mean
            inv_std = lax.rsqrt(jnp.maximum(cum_var, 0.0) + EPS)      # EUP
            return (z - cum_mean) * inv_std * gain + bias             # f32

        # --- 1x1 conv (MXU) + PReLU + cLN ------------------------------------
        out = jnp.dot(w1, x.astype(cdt),
                      preferred_element_type=jnp.float32) + b1
        out = jnp.where(out >= 0.0, out, a1 * out)
        out = cln(out, g1, be1)

        # --- causal dilated depthwise conv: roll + mask taps (compute dtype) -
        out_c = out.astype(cdt)
        dw = wd[:, K - 1:K] * out_c + bd.astype(cdt)     # zero-shift tap
        for k, sh in dw_taps:
            tap = jnp.where(masks[sh],
                            pltpu.roll(out_c, shift=sh, axis=1), 0.0)
            dw = dw + wd[:, k:k + 1] * tap

        # --- PReLU + cLN ------------------------------------------------------
        dw = jnp.where(dw >= 0.0, dw, a2.astype(cdt) * dw)
        dw = cln(dw, g2, be2)

        # --- fused residual + skip 1x1 conv (one matmul, 8-aligned row split) -
        y = jnp.dot(wrs, dw.astype(cdt),
                    preferred_element_type=jnp.float32) + brs
        res_ref[...] = x + y[:c_in, :]
        skip_ref[...] = y[c_in:, :]

    return kernel


# ------------------------------- tiling policy --------------------------------
def _step_vmem_bytes(lane, c_in, c_skip, h, k):
    """Rough per-grid-step VMEM footprint (double-buffered I/O + live temps)."""
    io = 2 * 4 * lane * (2 * c_in + c_skip + 1)                 # x, res, skip, tau
    w = 2 * 4 * (h * (2 * c_in + c_skip + k + 9) + c_in + c_skip)
    inter = 4 * 4 * h * lane                                    # ~4 live (H, lane) f32 temps
    return io + w + inter


def _pick_batch_block(batch, seg_len_pad, c_in, c_skip, h, k,
                      lane_target, vmem_budget, min_steps):
    """Largest divisor of `batch` whose lane extent fits lane_target and the
    VMEM budget while leaving at least `min_steps` grid iterations."""
    max_d = max(1, batch // max(1, min_steps))
    best = 1
    for d in range(1, max_d + 1):
        if batch % d:
            continue
        lane = d * seg_len_pad
        if d > 1 and (lane > lane_target
                      or _step_vmem_bytes(lane, c_in, c_skip, h, k) > vmem_budget):
            continue
        best = d
    return best


# --------------------------------- wrapper -------------------------------------
def conv1d_block(x, params, kernel_size, dilation, *, batch_block=None,
                 lane_target=None, compute_dtype=None):
    """Conv1DBlock forward. x: (B, C_in, L) f32. Returns (x + res, skip)."""
    (w1, b1, a1, g1, be1, wd, bd, a2, g2, be2, wr, br, ws, bs) = params
    B, C_in, L = x.shape
    H = w1.shape[0]
    C_skip = ws.shape[0]
    K, D = kernel_size, dilation

    kind = _device_kind()
    is_v7 = "v7" in kind
    if compute_dtype is None:
        compute_dtype = _pick_compute_dtype(kind)
    if lane_target is None:
        # v7x: smaller VMEM (64 MiB) + more HBM bw -> smaller tiles;
        # v5e/v6e: bigger tiles amortize the ~0.35us per-grid-step overhead.
        lane_target = 2048 if is_v7 else 4096
    if is_v7:
        vmem_limit = 48 << 20            # headroom under 64 MiB physical
    elif "v5" in kind or "v6" in kind:
        vmem_limit = 64 << 20            # raise the 16/32 MiB scoped default
    else:
        vmem_limit = None                # unknown chip: keep compiler default

    # Pad channel counts to sublane multiples (8) so the fused res/skip row
    # split and every store stay (8,128)-tile aligned, and pad the time axis
    # to a lane multiple (128) so output stores are unmasked lane-dense vst.
    C_in_p = _round_up(C_in, 8)
    C_skip_p = _round_up(C_skip, 8)
    Lp = _round_up(L, 128)
    x_p = jnp.pad(x, ((0, 0), (0, C_in_p - C_in), (0, Lp - L)))
    w1_p = jnp.pad(w1, ((0, 0), (0, C_in_p - C_in)))
    wr_p = jnp.pad(wr, ((0, C_in_p - C_in), (0, 0)))
    br_p = jnp.pad(br, ((0, C_in_p - C_in), (0, 0)))
    ws_p = jnp.pad(ws, ((0, C_skip_p - C_skip), (0, 0)))
    bs_p = jnp.pad(bs, ((0, C_skip_p - C_skip), (0, 0)))

    # v7x has 2 TensorCores fed by sharding the parallel grid axis: make sure
    # there are at least 2 grid steps whenever B allows it.
    min_steps = 2 if (is_v7 and B >= 2) else 1
    if batch_block is None:
        budget = (vmem_limit if vmem_limit else (32 << 20)) * 3 // 4
        batch_block = _pick_batch_block(B, Lp, C_in_p, C_skip_p, H, K,
                                        lane_target, budget, min_steps)
    assert B % batch_block == 0
    lane_block = batch_block * Lp
    grid = (B // batch_block,)

    # Lane-dense layout: per-batch time segments concatenated along lanes.
    x_t = jnp.transpose(x_p, (1, 0, 2)).reshape(C_in_p, B * Lp)
    # Per-segment time index (int32); 1/(H*(tau+1)) is derived in-kernel.
    tau = jnp.tile(jnp.arange(Lp, dtype=jnp.int32), B).reshape(1, B * Lp)

    # Packed per-channel f32 params: [b1 g1 be1 bd g2 be2 a1 a2] -> (H, 8).
    hp = jnp.concatenate(
        [b1, g1, be1, bd, g2, be2,
         jnp.broadcast_to(a1.astype(jnp.float32), (H, 1)),
         jnp.broadcast_to(a2.astype(jnp.float32), (H, 1))], axis=1)
    # Matmul weights in the compute dtype; fused residual+skip weight stack.
    w1_c = w1_p.astype(compute_dtype)
    wd_c = wd.astype(compute_dtype)
    wrs = jnp.concatenate([wr_p, ws_p], axis=0).astype(compute_dtype)
    brs = jnp.concatenate([br_p, bs_p], axis=0)

    def lane_spec(c):
        return pl.BlockSpec((c, lane_block), lambda i: (0, i))

    def full_spec(p):
        return pl.BlockSpec(p.shape, lambda i: (0, 0))

    res_t, skip_t = pl.pallas_call(
        make_kernel(K, D, L, C_in_p, H, compute_dtype),
        out_shape=(jax.ShapeDtypeStruct((C_in_p, B * Lp), jnp.float32),
                   jax.ShapeDtypeStruct((C_skip_p, B * Lp), jnp.float32)),
        grid_spec=pltpu.PrefetchScalarGridSpec(
            num_scalar_prefetch=0,
            grid=grid,
            in_specs=[lane_spec(C_in_p), lane_spec(1),
                      full_spec(w1_c), full_spec(hp), full_spec(wd_c),
                      full_spec(wrs), full_spec(brs)],
            out_specs=(lane_spec(C_in_p), lane_spec(C_skip_p)),
        ),
        compiler_params=pltpu.CompilerParams(
            dimension_semantics=("parallel",),
            vmem_limit_bytes=vmem_limit),
    )(x_t, tau, w1_c, hp, wd_c, wrs, brs)

    res = res_t.reshape(C_in_p, B, Lp).transpose(1, 0, 2)[:, :C_in, :L]
    skip = skip_t.reshape(C_skip_p, B, Lp).transpose(1, 0, 2)[:, :C_skip, :L]
    return res, skip


# ----------------------------- pure-JAX reference ----------------------------
def _cln_ref(x, gain, bias):
    B, C, L = x.shape
    step_sum = x.sum(1)
    step_pow = (x * x).sum(1)
    cum_sum = jnp.cumsum(step_sum, axis=1)
    cum_pow = jnp.cumsum(step_pow, axis=1)
    count = (jnp.arange(1, L + 1, dtype=jnp.float32) * C)[None, :]
    cum_mean = cum_sum / count
    cum_var = cum_pow / count - cum_mean ** 2
    cum_std = jnp.sqrt(cum_var + EPS)
    return ((x - cum_mean[:, None, :]) / cum_std[:, None, :]
            * gain[None, :, :] + bias[None, :, :])


def ref_forward(x, params, K, D):
    (w1, b1, a1, g1, be1, wd, bd, a2, g2, be2, wr, br, ws, bs) = params
    B, C_in, L = x.shape
    out = jnp.einsum('hc,bcl->bhl', w1, x, precision=_HI) + b1[None, :, :]
    out = jnp.where(out >= 0, out, a1[0, 0] * out)
    out = _cln_ref(out, g1, be1)
    pad = (K - 1) * D
    outp = jnp.pad(out, ((0, 0), (0, 0), (pad, 0)))
    dw = jnp.zeros_like(out) + bd[None, :, :]
    for k in range(K):
        dw = dw + wd[:, k][None, :, None] * outp[:, :, k * D: k * D + L]
    dw = jnp.where(dw >= 0, dw, a2[0, 0] * dw)
    dw = _cln_ref(dw, g2, be2)
    res = jnp.einsum('ch,bhl->bcl', wr, dw, precision=_HI) + br[None, :, :]
    skip = jnp.einsum('sh,bhl->bsl', ws, dw, precision=_HI) + bs[None, :, :]
    return x + res, skip


if __name__ == "__main__":
    # small deterministic config: Conv1DBlock(8, 16, 16, kernel_size=3, dilation=2, norm='cLN')
    B, C_in, H, C_skip, L = 2, 8, 16, 16, 128
    K, D = 3, 2

    keys = jax.random.split(jax.random.PRNGKey(0), 12)
    x = jax.random.normal(keys[0], (B, C_in, L), jnp.float32)

    w1 = jax.random.normal(keys[1], (H, C_in), jnp.float32) * 0.1   # conv.weight (1x1)
    b1 = jax.random.normal(keys[2], (H, 1), jnp.float32) * 0.1
    a1 = jnp.full((1, 1), 0.25, jnp.float32)                        # prelu_1 (default init)
    g1 = 1.0 + 0.1 * jax.random.normal(keys[3], (H, 1), jnp.float32)
    be1 = 0.1 * jax.random.normal(keys[4], (H, 1), jnp.float32)
    wd = jax.random.normal(keys[5], (H, K), jnp.float32) * 0.1      # d_conv depthwise weight
    bd = jax.random.normal(keys[6], (H, 1), jnp.float32) * 0.1
    a2 = jnp.full((1, 1), 0.25, jnp.float32)                        # prelu_2
    g2 = 1.0 + 0.1 * jax.random.normal(keys[7], (H, 1), jnp.float32)
    be2 = 0.1 * jax.random.normal(keys[8], (H, 1), jnp.float32)
    wr = jax.random.normal(keys[9], (C_in, H), jnp.float32) * 0.1   # res_conv
    br = jax.random.normal(keys[10], (C_in, 1), jnp.float32) * 0.1
    ws = jax.random.normal(keys[11], (C_skip, H), jnp.float32) * 0.1  # skip_conv
    bs = jnp.zeros((C_skip, 1), jnp.float32)

    params = (w1, b1, a1, g1, be1, wd, bd, a2, g2, be2, wr, br, ws, bs)

    res, skip = conv1d_block(x, params, K, D)
    jax.block_until_ready((res, skip))

    res_ref, skip_ref = ref_forward(x, params, K, D)
    # f32 path (v5e/older): default-MXU + re-associated scan tolerance (2e-2);
    # bf16 path (v6e/v7x): slightly wider (cLN statistics/normalization stay f32).
    bf16 = jnp.dtype(_pick_compute_dtype()) == jnp.dtype(jnp.bfloat16)
    tol = 4e-2 if bf16 else 2e-2
    np.testing.assert_allclose(np.asarray(res), np.asarray(res_ref), rtol=tol, atol=tol)
    np.testing.assert_allclose(np.asarray(skip), np.asarray(skip_ref), rtol=tol, atol=tol)

    print("KERNEL_OK")
</pallas_src>

<mosaic_0001>
module attributes {stable_mosaic.version = 11 : i64} {
  func.func @kernel(%arg0: i32, %arg1: memref<8x256xf32, #tpu.memory_space<vmem>>, %arg2: memref<1x256xi32, #tpu.memory_space<vmem>>, %arg3: memref<16x8xf32, #tpu.memory_space<vmem>>, %arg4: memref<16x8xf32, #tpu.memory_space<vmem>>, %arg5: memref<16x3xf32, #tpu.memory_space<vmem>>, %arg6: memref<24x16xf32, #tpu.memory_space<vmem>>, %arg7: memref<24x1xf32, #tpu.memory_space<vmem>>, %arg8: memref<8x256xf32, #tpu.memory_space<vmem>>, %arg9: memref<16x256xf32, #tpu.memory_space<vmem>>) attributes {dimension_semantics = [#tpu.dimension_semantics<parallel>], iteration_bounds = array<i64: 1>, scalar_prefetch = 0 : i64, scratch_operands = 0 : i64, tpu.core_type = #tpu.core_type<tc>, window_params = [{transform_indices = @transform_0, window_bounds = array<i64: 8, 256>}, {transform_indices = @transform_1, window_bounds = array<i64: 1, 256>}, {pipeline_mode = #tpu.pipeline_mode<synchronous>, transform_indices = @transform_2, window_bounds = array<i64: 16, 8>}, {pipeline_mode = #tpu.pipeline_mode<synchronous>, transform_indices = @transform_3, window_bounds = array<i64: 16, 8>}, {pipeline_mode = #tpu.pipeline_mode<synchronous>, transform_indices = @transform_4, window_bounds = array<i64: 16, 3>}, {pipeline_mode = #tpu.pipeline_mode<synchronous>, transform_indices = @transform_5, window_bounds = array<i64: 24, 16>}, {pipeline_mode = #tpu.pipeline_mode<synchronous>, transform_indices = @transform_6, window_bounds = array<i64: 24, 1>}, {transform_indices = @transform_7, window_bounds = array<i64: 8, 256>}, {transform_indices = @transform_8, window_bounds = array<i64: 16, 256>}]} {
    %c0 = arith.constant 0 : index
    %c0_0 = arith.constant 0 : index
    %0 = vector.load %arg1[%c0, %c0_0] : memref<8x256xf32, #tpu.memory_space<vmem>>, vector<8x256xf32>
    %c0_1 = arith.constant 0 : index
    %c0_2 = arith.constant 0 : index
    %1 = vector.load %arg2[%c0_1, %c0_2] : memref<1x256xi32, #tpu.memory_space<vmem>>, vector<1x256xi32>
    %c0_3 = arith.constant 0 : index
    %c0_4 = arith.constant 0 : index
    %2 = vector.load %arg3[%c0_3, %c0_4] : memref<16x8xf32, #tpu.memory_space<vmem>>, vector<16x8xf32>
    %c0_5 = arith.constant 0 : index
    %c0_6 = arith.constant 0 : index
    %3 = vector.load %arg4[%c0_5, %c0_6] : memref<16x8xf32, #tpu.memory_space<vmem>>, vector<16x8xf32>
    %c0_7 = arith.constant 0 : index
    %c0_8 = arith.constant 0 : index
    %4 = vector.load %arg5[%c0_7, %c0_8] : memref<16x3xf32, #tpu.memory_space<vmem>>, vector<16x3xf32>
    %c0_9 = arith.constant 0 : index
    %c0_10 = arith.constant 0 : index
    %5 = vector.load %arg6[%c0_9, %c0_10] : memref<24x16xf32, #tpu.memory_space<vmem>>, vector<24x16xf32>
    %c0_11 = arith.constant 0 : index
    %c0_12 = arith.constant 0 : index
    %6 = vector.load %arg7[%c0_11, %c0_12] : memref<24x1xf32, #tpu.memory_space<vmem>>, vector<24x1xf32>
    %7 = vector.extract_strided_slice %3 {offsets = [0, 0], sizes = [16, 1], strides = [1, 1]} : vector<16x8xf32> to vector<16x1xf32>
    %8 = vector.extract_strided_slice %3 {offsets = [0, 1], sizes = [16, 1], strides = [1, 1]} : vector<16x8xf32> to vector<16x1xf32>
    %9 = vector.extract_strided_slice %3 {offsets = [0, 2], sizes = [16, 1], strides = [1, 1]} : vector<16x8xf32> to vector<16x1xf32>
    %10 = vector.extract_strided_slice %3 {offsets = [0, 3], sizes = [16, 1], strides = [1, 1]} : vector<16x8xf32> to vector<16x1xf32>
    %11 = vector.extract_strided_slice %3 {offsets = [0, 4], sizes = [16, 1], strides = [1, 1]} : vector<16x8xf32> to vector<16x1xf32>
    %12 = vector.extract_strided_slice %3 {offsets = [0, 5], sizes = [16, 1], strides = [1, 1]} : vector<16x8xf32> to vector<16x1xf32>
    %13 = vector.extract_strided_slice %3 {offsets = [0, 6], sizes = [16, 1], strides = [1, 1]} : vector<16x8xf32> to vector<16x1xf32>
    %14 = vector.extract_strided_slice %3 {offsets = [0, 7], sizes = [16, 1], strides = [1, 1]} : vector<16x8xf32> to vector<16x1xf32>
    %c1_i32 = arith.constant 1 : i32
    %15 = vector.broadcast %c1_i32 : i32 to vector<1x256xi32>
    %16 = arith.cmpi sge, %1, %15 : vector<1x256xi32>
    %c2_i32 = arith.constant 2 : i32
    %17 = vector.broadcast %c2_i32 : i32 to vector<1x256xi32>
    %18 = arith.cmpi sge, %1, %17 : vector<1x256xi32>
    %c4_i32 = arith.constant 4 : i32
    %19 = vector.broadcast %c4_i32 : i32 to vector<1x256xi32>
    %20 = arith.cmpi sge, %1, %19 : vector<1x256xi32>
    %c8_i32 = arith.constant 8 : i32
    %21 = vector.broadcast %c8_i32 : i32 to vector<1x256xi32>
    %22 = arith.cmpi sge, %1, %21 : vector<1x256xi32>
    %c16_i32 = arith.constant 16 : i32
    %23 = vector.broadcast %c16_i32 : i32 to vector<1x256xi32>
    %24 = arith.cmpi sge, %1, %23 : vector<1x256xi32>
    %c32_i32 = arith.constant 32 : i32
    %25 = vector.broadcast %c32_i32 : i32 to vector<1x256xi32>
    %26 = arith.cmpi sge, %1, %25 : vector<1x256xi32>
    %c64_i32 = arith.constant 64 : i32
    %27 = vector.broadcast %c64_i32 : i32 to vector<1x256xi32>
    %28 = arith.cmpi sge, %1, %27 : vector<1x256xi32>
    %29 = arith.sitofp %1 : vector<1x256xi32> to vector<1x256xf32>
    %cst = arith.constant 1.000000e+00 : f32
    %30 = vector.broadcast %cst : f32 to vector<1x256xf32>
    %31 = arith.addf %29, %30 : vector<1x256xf32>
    %cst_13 = arith.constant 1.600000e+01 : f32
    %32 = vector.broadcast %cst_13 : f32 to vector<1x256xf32>
    %33 = arith.mulf %32, %31 : vector<1x256xf32>
    %cst_14 = arith.constant 1.000000e+00 : f32
    %34 = vector.broadcast %cst_14 : f32 to vector<1x256xf32>
    %35 = arith.divf %34, %33 : vector<1x256xf32>
    %cst_15 = arith.constant 1.000000e+00 : f32
    %36 = vector.broadcast %cst_15 : f32 to vector<1x16xf32>
    %cst_16 = arith.constant dense<0.000000e+00> : vector<16x256xf32>
    %37 = tpu.matmul %2, %0, %cst_16 {dimension_numbers = #tpu.dot_dimension_numbers<[1], [0], [0], [1], [0, 0, 1, 1], [], []>} : vector<16x8xf32>, vector<8x256xf32>, vector<16x256xf32> -> vector<16x256xf32>
    %38 = vector.broadcast %7 : vector<16x1xf32> to vector<16x256xf32>
    %39 = arith.addf %37, %38 : vector<16x256xf32>
    %cst_17 = arith.constant 0.000000e+00 : f32
    %40 = vector.broadcast %cst_17 : f32 to vector<16x256xf32>
    %41 = arith.cmpf oge, %39, %40 : vector<16x256xf32>
    %42 = vector.broadcast %13 : vector<16x1xf32> to vector<16x256xf32>
    %43 = arith.mulf %42, %39 : vector<16x256xf32>
    %44 = arith.select %41, %39, %43 : vector<16x256xi1>, vector<16x256xf32>
    %cst_18 = arith.constant dense<0.000000e+00> : vector<1x256xf32>
    %45 = tpu.matmul %36, %44, %cst_18 {dimension_numbers = #tpu.dot_dimension_numbers<[1], [0], [0], [1], [0, 0, 1, 1], [], []>, precision = #tpu.contract_precision<fp32>} : vector<1x16xf32>, vector<16x256xf32>, vector<1x256xf32> -> vector<1x256xf32>
    %46 = arith.mulf %44, %44 : vector<16x256xf32>
    %cst_19 = arith.constant dense<0.000000e+00> : vector<1x256xf32>
    %47 = tpu.matmul %36, %46, %cst_19 {dimension_numbers = #tpu.dot_dimension_numbers<[1], [0], [0], [1], [0, 0, 1, 1], [], []>, precision = #tpu.contract_precision<fp32>} : vector<1x16xf32>, vector<16x256xf32>, vector<1x256xf32> -> vector<1x256xf32>
    %48 = tpu.concatenate %45, %47 in 0 : vector<1x256xf32>, vector<1x256xf32> -> vector<2x256xf32>
    %c1_i32_20 = arith.constant 1 : i32
    %49 = tpu.dynamic_rotate %48 by %c1_i32_20 dim 1 : vector<2x256xf32>, i32 -> vector<2x256xf32>
    %cst_21 = arith.constant 0.000000e+00 : f32
    %50 = vector.shape_cast %16 : vector<1x256xi1> to vector<1x256xi1>
    %51 = vector.broadcast %50 : vector<1x256xi1> to vector<2x256xi1>
    %52 = vector.broadcast %cst_21 : f32 to vector<2x256xf32>
    %53 = arith.select %51, %49, %52 : vector<2x256xi1>, vector<2x256xf32>
    %54 = arith.addf %48, %53 : vector<2x256xf32>
    %c2_i32_22 = arith.constant 2 : i32
    %55 = tpu.dynamic_rotate %54 by %c2_i32_22 dim 1 : vector<2x256xf32>, i32 -> vector<2x256xf32>
    %cst_23 = arith.constant 0.000000e+00 : f32
    %56 = vector.shape_cast %18 : vector<1x256xi1> to vector<1x256xi1>
    %57 = vector.broadcast %56 : vector<1x256xi1> to vector<2x256xi1>
    %58 = vector.broadcast %cst_23 : f32 to vector<2x256xf32>
    %59 = arith.select %57, %55, %58 : vector<2x256xi1>, vector<2x256xf32>
    %60 = arith.addf %54, %59 : vector<2x256xf32>
    %c4_i32_24 = arith.constant 4 : i32
    %61 = tpu.dynamic_rotate %60 by %c4_i32_24 dim 1 : vector<2x256xf32>, i32 -> vector<2x256xf32>
    %cst_25 = arith.constant 0.000000e+00 : f32
    %62 = vector.shape_cast %20 : vector<1x256xi1> to vector<1x256xi1>
    %63 = vector.broadcast %62 : vector<1x256xi1> to vector<2x256xi1>
    %64 = vector.broadcast %cst_25 : f32 to vector<2x256xf32>
    %65 = arith.select %63, %61, %64 : vector<2x256xi1>, vector<2x256xf32>
    %66 = arith.addf %60, %65 : vector<2x256xf32>
    %c8_i32_26 = arith.constant 8 : i32
    %67 = tpu.dynamic_rotate %66 by %c8_i32_26 dim 1 : vector<2x256xf32>, i32 -> vector<2x256xf32>
    %cst_27 = arith.constant 0.000000e+00 : f32
    %68 = vector.shape_cast %22 : vector<1x256xi1> to vector<1x256xi1>
    %69 = vector.broadcast %68 : vector<1x256xi1> to vector<2x256xi1>
    %70 = vector.broadcast %cst_27 : f32 to vector<2x256xf32>
    %71 = arith.select %69, %67, %70 : vector<2x256xi1>, vector<2x256xf32>
    %72 = arith.addf %66, %71 : vector<2x256xf32>
    %c16_i32_28 = arith.constant 16 : i32
    %73 = tpu.dynamic_rotate %72 by %c16_i32_28 dim 1 : vector<2x256xf32>, i32 -> vector<2x256xf32>
    %cst_29 = arith.constant 0.000000e+00 : f32
    %74 = vector.shape_cast %24 : vector<1x256xi1> to vector<1x256xi1>
    %75 = vector.broadcast %74 : vector<1x256xi1> to vector<2x256xi1>
    %76 = vector.broadcast %cst_29 : f32 to vector<2x256xf32>
    %77 = arith.select %75, %73, %76 : vector<2x256xi1>, vector<2x256xf32>
    %78 = arith.addf %72, %77 : vector<2x256xf32>
    %c32_i32_30 = arith.constant 32 : i32
    %79 = tpu.dynamic_rotate %78 by %c32_i32_30 dim 1 : vector<2x256xf32>, i32 -> vector<2x256xf32>
    %cst_31 = arith.constant 0.000000e+00 : f32
    %80 = vector.shape_cast %26 : vector<1x256xi1> to vector<1x256xi1>
    %81 = vector.broadcast %80 : vector<1x256xi1> to vector<2x256xi1>
    %82 = vector.broadcast %cst_31 : f32 to vector<2x256xf32>
    %83 = arith.select %81, %79, %82 : vector<2x256xi1>, vector<2x256xf32>
    %84 = arith.addf %78, %83 : vector<2x256xf32>
    %c64_i32_32 = arith.constant 64 : i32
    %85 = tpu.dynamic_rotate %84 by %c64_i32_32 dim 1 : vector<2x256xf32>, i32 -> vector<2x256xf32>
    %cst_33 = arith.constant 0.000000e+00 : f32
    %86 = vector.shape_cast %28 : vector<1x256xi1> to vector<1x256xi1>
    %87 = vector.broadcast %86 : vector<1x256xi1> to vector<2x256xi1>
    %88 = vector.broadcast %cst_33 : f32 to vector<2x256xf32>
    %89 = arith.select %87, %85, %88 : vector<2x256xi1>, vector<2x256xf32>
    %90 = arith.addf %84, %89 : vector<2x256xf32>
    %91 = vector.extract_strided_slice %90 {offsets = [0, 0], sizes = [1, 256], strides = [1, 1]} : vector<2x256xf32> to vector<1x256xf32>
    %92 = arith.mulf %91, %35 : vector<1x256xf32>
    %93 = vector.extract_strided_slice %90 {offsets = [1, 0], sizes = [1, 256], strides = [1, 1]} : vector<2x256xf32> to vector<1x256xf32>
    %94 = arith.mulf %93, %35 : vector<1x256xf32>
    %95 = arith.mulf %92, %92 : vector<1x256xf32>
    %96 = arith.subf %94, %95 : vector<1x256xf32>
    %cst_34 = arith.constant 0.000000e+00 : f32
    %97 = vector.broadcast %cst_34 : f32 to vector<1x256xf32>
    %98 = arith.maximumf %96, %97 : vector<1x256xf32>
    %cst_35 = arith.constant 1.000000e-10 : f32
    %99 = vector.broadcast %cst_35 : f32 to vector<1x256xf32>
    %100 = arith.addf %98, %99 : vector<1x256xf32>
    %101 = math.rsqrt %100 : vector<1x256xf32>
    %102 = vector.broadcast %92 : vector<1x256xf32> to vector<16x256xf32>
    %103 = arith.subf %44, %102 : vector<16x256xf32>
    %104 = vector.broadcast %101 : vector<1x256xf32> to vector<16x256xf32>
    %105 = arith.mulf %103, %104 : vector<16x256xf32>
    %106 = vector.broadcast %8 : vector<16x1xf32> to vector<16x256xf32>
    %107 = arith.mulf %105, %106 : vector<16x256xf32>
    %108 = vector.broadcast %9 : vector<16x1xf32> to vector<16x256xf32>
    %109 = arith.addf %107, %108 : vector<16x256xf32>
    %110 = vector.extract_strided_slice %4 {offsets = [0, 2], sizes = [16, 1], strides = [1, 1]} : vector<16x3xf32> to vector<16x1xf32>
    %111 = vector.broadcast %110 : vector<16x1xf32> to vector<16x256xf32>
    %112 = arith.mulf %111, %109 : vector<16x256xf32>
    %113 = vector.broadcast %10 : vector<16x1xf32> to vector<16x256xf32>
    %114 = arith.addf %112, %113 : vector<16x256xf32>
    %c4_i32_36 = arith.constant 4 : i32
    %115 = tpu.dynamic_rotate %109 by %c4_i32_36 dim 1 : vector<16x256xf32>, i32 -> vector<16x256xf32>
    %cst_37 = arith.constant 0.000000e+00 : f32
    %116 = vector.shape_cast %20 : vector<1x256xi1> to vector<1x256xi1>
    %117 = vector.broadcast %116 : vector<1x256xi1> to vector<16x256xi1>
    %118 = vector.broadcast %cst_37 : f32 to vector<16x256xf32>
    %119 = arith.select %117, %115, %118 : vector<16x256xi1>, vector<16x256xf32>
    %120 = vector.extract_strided_slice %4 {offsets = [0, 0], sizes = [16, 1], strides = [1, 1]} : vector<16x3xf32> to vector<16x1xf32>
    %121 = vector.broadcast %120 : vector<16x1xf32> to vector<16x256xf32>
    %122 = arith.mulf %121, %119 : vector<16x256xf32>
    %123 = arith.addf %114, %122 : vector<16x256xf32>
    %c2_i32_38 = arith.constant 2 : i32
    %124 = tpu.dynamic_rotate %109 by %c2_i32_38 dim 1 : vector<16x256xf32>, i32 -> vector<16x256xf32>
    %cst_39 = arith.constant 0.000000e+00 : f32
    %125 = vector.shape_cast %18 : vector<1x256xi1> to vector<1x256xi1>
    %126 = vector.broadcast %125 : vector<1x256xi1> to vector<16x256xi1>
    %127 = vector.broadcast %cst_39 : f32 to vector<16x256xf32>
    %128 = arith.select %126, %124, %127 : vector<16x256xi1>, vector<16x256xf32>
    %129 = vector.extract_strided_slice %4 {offsets = [0, 1], sizes = [16, 1], strides = [1, 1]} : vector<16x3xf32> to vector<16x1xf32>
    %130 = vector.broadcast %129 : vector<16x1xf32> to vector<16x256xf32>
    %131 = arith.mulf %130, %128 : vector<16x256xf32>
    %132 = arith.addf %123, %131 : vector<16x256xf32>
    %cst_40 = arith.constant 0.000000e+00 : f32
    %133 = vector.broadcast %cst_40 : f32 to vector<16x256xf32>
    %134 = arith.cmpf oge, %132, %133 : vector<16x256xf32>
    %135 = vector.broadcast %14 : vector<16x1xf32> to vector<16x256xf32>
    %136 = arith.mulf %135, %132 : vector<16x256xf32>
    %137 = arith.select %134, %132, %136 : vector<16x256xi1>, vector<16x256xf32>
    %cst_41 = arith.constant dense<0.000000e+00> : vector<1x256xf32>
    %138 = tpu.matmul %36, %137, %cst_41 {dimension_numbers = #tpu.dot_dimension_numbers<[1], [0], [0], [1], [0, 0, 1, 1], [], []>, precision = #tpu.contract_precision<fp32>} : vector<1x16xf32>, vector<16x256xf32>, vector<1x256xf32> -> vector<1x256xf32>
    %139 = arith.mulf %137, %137 : vector<16x256xf32>
    %cst_42 = arith.constant dense<0.000000e+00> : vector<1x256xf32>
    %140 = tpu.matmul %36, %139, %cst_42 {dimension_numbers = #tpu.dot_dimension_numbers<[1], [0], [0], [1], [0, 0, 1, 1], [], []>, precision = #tpu.contract_precision<fp32>} : vector<1x16xf32>, vector<16x256xf32>, vector<1x256xf32> -> vector<1x256xf32>
    %141 = tpu.concatenate %138, %140 in 0 : vector<1x256xf32>, vector<1x256xf32> -> vector<2x256xf32>
    %c1_i32_43 = arith.constant 1 : i32
    %142 = tpu.dynamic_rotate %141 by %c1_i32_43 dim 1 : vector<2x256xf32>, i32 -> vector<2x256xf32>
    %cst_44 = arith.constant 0.000000e+00 : f32
    %143 = vector.shape_cast %16 : vector<1x256xi1> to vector<1x256xi1>
    %144 = vector.broadcast %143 : vector<1x256xi1> to vector<2x256xi1>
    %145 = vector.broadcast %cst_44 : f32 to vector<2x256xf32>
    %146 = arith.select %144, %142, %145 : vector<2x256xi1>, vector<2x256xf32>
    %147 = arith.addf %141, %146 : vector<2x256xf32>
    %c2_i32_45 = arith.constant 2 : i32
    %148 = tpu.dynamic_rotate %147 by %c2_i32_45 dim 1 : vector<2x256xf32>, i32 -> vector<2x256xf32>
    %cst_46 = arith.constant 0.000000e+00 : f32
    %149 = vector.shape_cast %18 : vector<1x256xi1> to vector<1x256xi1>
    %150 = vector.broadcast %149 : vector<1x256xi1> to vector<2x256xi1>
    %151 = vector.broadcast %cst_46 : f32 to vector<2x256xf32>
    %152 = arith.select %150, %148, %151 : vector<2x256xi1>, vector<2x256xf32>
    %153 = arith.addf %147, %152 : vector<2x256xf32>
    %c4_i32_47 = arith.constant 4 : i32
    %154 = tpu.dynamic_rotate %153 by %c4_i32_47 dim 1 : vector<2x256xf32>, i32 -> vector<2x256xf32>
    %cst_48 = arith.constant 0.000000e+00 : f32
    %155 = vector.shape_cast %20 : vector<1x256xi1> to vector<1x256xi1>
    %156 = vector.broadcast %155 : vector<1x256xi1> to vector<2x256xi1>
    %157 = vector.broadcast %cst_48 : f32 to vector<2x256xf32>
    %158 = arith.select %156, %154, %157 : vector<2x256xi1>, vector<2x256xf32>
    %159 = arith.addf %153, %158 : vector<2x256xf32>
    %c8_i32_49 = arith.constant 8 : i32
    %160 = tpu.dynamic_rotate %159 by %c8_i32_49 dim 1 : vector<2x256xf32>, i32 -> vector<2x256xf32>
    %cst_50 = arith.constant 0.000000e+00 : f32
    %161 = vector.shape_cast %22 : vector<1x256xi1> to vector<1x256xi1>
    %162 = vector.broadcast %161 : vector<1x256xi1> to vector<2x256xi1>
    %163 = vector.broadcast %cst_50 : f32 to vector<2x256xf32>
    %164 = arith.select %162, %160, %163 : vector<2x256xi1>, vector<2x256xf32>
    %165 = arith.addf %159, %164 : vector<2x256xf32>
    %c16_i32_51 = arith.constant 16 : i32
    %166 = tpu.dynamic_rotate %165 by %c16_i32_51 dim 1 : vector<2x256xf32>, i32 -> vector<2x256xf32>
    %cst_52 = arith.constant 0.000000e+00 : f32
    %167 = vector.shape_cast %24 : vector<1x256xi1> to vector<1x256xi1>
    %168 = vector.broadcast %167 : vector<1x256xi1> to vector<2x256xi1>
    %169 = vector.broadcast %cst_52 : f32 to vector<2x256xf32>
    %170 = arith.select %168, %166, %169 : vector<2x256xi1>, vector<2x256xf32>
    %171 = arith.addf %165, %170 : vector<2x256xf32>
    %c32_i32_53 = arith.constant 32 : i32
    %172 = tpu.dynamic_rotate %171 by %c32_i32_53 dim 1 : vector<2x256xf32>, i32 -> vector<2x256xf32>
    %cst_54 = arith.constant 0.000000e+00 : f32
    %173 = vector.shape_cast %26 : vector<1x256xi1> to vector<1x256xi1>
    %174 = vector.broadcast %173 : vector<1x256xi1> to vector<2x256xi1>
    %175 = vector.broadcast %cst_54 : f32 to vector<2x256xf32>
    %176 = arith.select %174, %172, %175 : vector<2x256xi1>, vector<2x256xf32>
    %177 = arith.addf %171, %176 : vector<2x256xf32>
    %c64_i32_55 = arith.constant 64 : i32
    %178 = tpu.dynamic_rotate %177 by %c64_i32_55 dim 1 : vector<2x256xf32>, i32 -> vector<2x256xf32>
    %cst_56 = arith.constant 0.000000e+00 : f32
    %179 = vector.shape_cast %28 : vector<1x256xi1> to vector<1x256xi1>
    %180 = vector.broadcast %179 : vector<1x256xi1> to vector<2x256xi1>
    %181 = vector.broadcast %cst_56 : f32 to vector<2x256xf32>
    %182 = arith.select %180, %178, %181 : vector<2x256xi1>, vector<2x256xf32>
    %183 = arith.addf %177, %182 : vector<2x256xf32>
    %184 = vector.extract_strided_slice %183 {offsets = [0, 0], sizes = [1, 256], strides = [1, 1]} : vector<2x256xf32> to vector<1x256xf32>
    %185 = arith.mulf %184, %35 : vector<1x256xf32>
    %186 = vector.extract_strided_slice %183 {offsets = [1, 0], sizes = [1, 256], strides = [1, 1]} : vector<2x256xf32> to vector<1x256xf32>
    %187 = arith.mulf %186, %35 : vector<1x256xf32>
    %188 = arith.mulf %185, %185 : vector<1x256xf32>
    %189 = arith.subf %187, %188 : vector<1x256xf32>
    %cst_57 = arith.constant 0.000000e+00 : f32
    %190 = vector.broadcast %cst_57 : f32 to vector<1x256xf32>
    %191 = arith.maximumf %189, %190 : vector<1x256xf32>
    %cst_58 = arith.constant 1.000000e-10 : f32
    %192 = vector.broadcast %cst_58 : f32 to vector<1x256xf32>
    %193 = arith.addf %191, %192 : vector<1x256xf32>
    %194 = math.rsqrt %193 : vector<1x256xf32>
    %195 = vector.broadcast %185 : vector<1x256xf32> to vector<16x256xf32>
    %196 = arith.subf %137, %195 : vector<16x256xf32>
    %197 = vector.broadcast %194 : vector<1x256xf32> to vector<16x256xf32>
    %198 = arith.mulf %196, %197 : vector<16x256xf32>
    %199 = vector.broadcast %11 : vector<16x1xf32> to vector<16x256xf32>
    %200 = arith.mulf %198, %199 : vector<16x256xf32>
    %201 = vector.broadcast %12 : vector<16x1xf32> to vector<16x256xf32>
    %202 = arith.addf %200, %201 : vector<16x256xf32>
    %cst_59 = arith.constant dense<0.000000e+00> : vector<24x256xf32>
    %203 = tpu.matmul %5, %202, %cst_59 {dimension_numbers = #tpu.dot_dimension_numbers<[1], [0], [0], [1], [0, 0, 1, 1], [], []>} : vector<24x16xf32>, vector<16x256xf32>, vector<24x256xf32> -> vector<24x256xf32>
    %204 = vector.broadcast %6 : vector<24x1xf32> to vector<24x256xf32>
    %205 = arith.addf %203, %204 : vector<24x256xf32>
    %206 = vector.extract_strided_slice %205 {offsets = [0, 0], sizes = [8, 256], strides = [1, 1]} : vector<24x256xf32> to vector<8x256xf32>
    %207 = arith.addf %0, %206 : vector<8x256xf32>
    %c0_60 = arith.constant 0 : index
    %c0_61 = arith.constant 0 : index
    %208 = vector.load %arg8[%c0_60, %c0_61] : memref<8x256xf32, #tpu.memory_space<vmem>>, vector<8x256xf32>
    tpu.vector_store %arg8[%c0_60, %c0_61], %207 {strides = array<i32>} : memref<8x256xf32, #tpu.memory_space<vmem>>, vector<8x256xf32>,
    %209 = vector.extract_strided_slice %205 {offsets = [8, 0], sizes = [16, 256], strides = [1, 1]} : vector<24x256xf32> to vector<16x256xf32>
    %c0_62 = arith.constant 0 : index
    %c0_63 = arith.constant 0 : index
    %210 = vector.load %arg9[%c0_62, %c0_63] : memref<16x256xf32, #tpu.memory_space<vmem>>, vector<16x256xf32>
    tpu.vector_store %arg9[%c0_62, %c0_63], %209 {strides = array<i32>} : memref<16x256xf32, #tpu.memory_space<vmem>>, vector<16x256xf32>,
    return
  }
  func.func @transform_0(%arg0: i32) -> (i32, i32) {
    %c0_i32 = arith.constant 0 : i32
    %c0_i32_0 = arith.constant 0 : i32
    return %c0_i32, %arg0 : i32, i32
  }
  func.func @transform_1(%arg0: i32) -> (i32, i32) {
    %c0_i32 = arith.constant 0 : i32
    %c0_i32_0 = arith.constant 0 : i32
    return %c0_i32, %arg0 : i32, i32
  }
  func.func @transform_2(%arg0: i32) -> (i32, i32) {
    %c0_i32 = arith.constant 0 : i32
    %c0_i32_0 = arith.constant 0 : i32
    %c0_i32_1 = arith.constant 0 : i32
    return %c0_i32, %c0_i32_0 : i32, i32
  }
  func.func @transform_3(%arg0: i32) -> (i32, i32) {
    %c0_i32 = arith.constant 0 : i32
    %c0_i32_0 = arith.constant 0 : i32
    %c0_i32_1 = arith.constant 0 : i32
    return %c0_i32, %c0_i32_0 : i32, i32
  }
  func.func @transform_4(%arg0: i32) -> (i32, i32) {
    %c0_i32 = arith.constant 0 : i32
    %c0_i32_0 = arith.constant 0 : i32
    %c0_i32_1 = arith.constant 0 : i32
    return %c0_i32, %c0_i32_0 : i32, i32
  }
  func.func @transform_5(%arg0: i32) -> (i32, i32) {
    %c0_i32 = arith.constant 0 : i32
    %c0_i32_0 = arith.constant 0 : i32
    %c0_i32_1 = arith.constant 0 : i32
    return %c0_i32, %c0_i32_0 : i32, i32
  }
  func.func @transform_6(%arg0: i32) -> (i32, i32) {
    %c0_i32 = arith.constant 0 : i32
    %c0_i32_0 = arith.constant 0 : i32
    %c0_i32_1 = arith.constant 0 : i32
    return %c0_i32, %c0_i32_0 : i32, i32
  }
  func.func @transform_7(%arg0: i32) -> (i32, i32) {
    %c0_i32 = arith.constant 0 : i32
    %c0_i32_0 = arith.constant 0 : i32
    return %c0_i32, %arg0 : i32, i32
  }
  func.func @transform_8(%arg0: i32) -> (i32, i32) {
    %c0_i32 = arith.constant 0 : i32
    %c0_i32_0 = arith.constant 0 : i32
    return %c0_i32, %arg0 : i32, i32
  }
}

</mosaic_0001>

<bundles_post_ra>
// kernel: tpu_custom_call.1
= control target key start
LH: loop header
LB: loop body
LE: loop exit
PB: predicated region body
PF: predicated region fallthrough
CT: control target
= control target key end

     0   :  { %14 = vsyncpa [#allocation3], 0  ;;  %vm67_vm0 = vcmask 64512   ;;  %v2900_v3 = vmov 0.0   ;;  %v2901_v5 = vmov 0   ;;  %s3585_s0 = inlined_call_operand.vmem [shape: f32[8,256], index: 0, kind: input, shape index: {}]   ;;  %s3586_s1 = inlined_call_operand.vmem [shape: s32[1,256], index: 1, kind: input, shape index: {}]   ;;  %s3587_s2 = inlined_call_operand.vmem [shape: f32[16,8], index: 2, kind: input, shape index: {}]   ;;  %s3588_s3 = inlined_call_operand.vmem [shape: f32[16,8], index: 3, kind: input, shape index: {}]   ;;  %s3589_s4 = inlined_call_operand.vmem [shape: f32[16,3], index: 4, kind: input, shape index: {}]   ;;  %s3590_s5 = inlined_call_operand.vmem [shape: f32[24,16], index: 5, kind: input, shape index: {}]   ;;  %s3591_s6 = inlined_call_operand.vmem [shape: f32[24,1], index: 6, kind: input, shape index: {}]   ;;  %s3592_s7 = inlined_call_operand.hbm [shape: f32[8,256], index: 7, kind: output, shape index: {0}]   ;;  %s3593_s8 = inlined_call_operand.hbm [shape: f32[16,256], index: 8, kind: output, shape index: {1}]  }
   0x1   :  { %v31_v0 = vld [vmem:[%s3585_s0 + $0x8] sm:$0xff]  ;;  %v30_v1 = vld [vmem:[%s3585_s0] sm:$0xff]  ;;  %138 = vmatprep.mubr.f32.mxu1 %v2900_v3  ;;  %2825 = vset.pattern.permute.xlu0 %v2901_v5 }
   0x2   :  { %v33_v2 = vld [vmem:[%s3587_s2] sm:$0xff]  ;;  %104 = vmatprep.subr.mxu1 %v31_v0  ;;  %v2978_v4 = vld [vmem:[%s3588_s3 + $0x8] sm:$0xff] }
   0x3   :  { %105 = vmatpush1.msra.mxu1 %v30_v1 }
   0x4   :  { %15 = vsyncpa [#allocation5], 0  ;;  %2788 = vmatmul.mubr.msk.f32.vlgmr.msra.gmra.mxu1 %vm67_vm0, %v33_v2  ;;  %64 = vperm.xlu0 %2825, %v2978_v4   ;;  %v34_v6 = vld [vmem:[%s3587_s2 + $0x8] sm:$0xff]  ;;  %v2902_v7 = vmov 6   ;;  %v2990_v8 = vld [vmem:[%s3588_s3] sm:$0xff]  ;;  %vm3598_vm1 = vcmask 130048  }
   0x5   :  { %144 = vmatprep.mubr.f32.mxu1 %v2900_v3  ;;  %2826 = vset.pattern.permute.xlu1 %v2902_v7  ;;  %v173_v12 = vsel %vm3598_vm1, 1.0, %v2901_v5  ;;  %v2903_v62 = vmov 1.0   ;;  %vm3597_vm6 = vcmask 1040384   ;;  %s2904_s2 = smov 1   ;;  %s2906_s19 = smov 4  }
   0x6   :  { %160 = vperm.xlu1 %2826, %v2978_v4   ;;  %419 = vmatprep.mubr.f32.mxu0 %v2900_v3  ;;  %v3000_v17 = vsub.f32 %v173_v12, %v173_v12  ;;  %s2907_s20 = smov 8   ;;  %s2908_s21 = smov 16  }
   0x7   :  { %s2910_s22 = smov 32   ;;  %s2911_s23 = smov 64  }
   0x8   :  { %2789 = vmatmul.mubr.msk.f32.gmra.mxu1 %vm67_vm0, %v34_v6  ;;  %59 = vperm.xlu0 %2825, %v2990_v8   ;;  %v3008_v26 = vand.u32 4294901760, %v3000_v17  ;;  %s2917_s18 = smov [#allocation2]  }
   0x9   :  { %243 = vmatprep.mubr.f32.mxu1 %v2900_v3 }
   0xa   :  { %156 = vperm.xlu1 %2826, %v2990_v8   ;;  %v247_v35 = vsub.f32 %v3000_v17, %v3008_v26 }
   0xc   :  { %v3036_v41 = vand.u32 4294901760, %v247_v35 }
  0x7f   :  { %v65_v9 = vpop.permute.xlu0 %64 }
  0x81   :  { %v161_v10 = vpop.permute.xlu1 %160 }
  0x83   :  { %v60_v11 = vpop.permute.xlu0 %59 }
  0x85   :  { %v157_v14 = vpop.permute.xlu1 %156 }
  0xc4   :  { %v140_v13 = vpop.f32.mrf.mxu1 }
  0xc5   :  { %v141_v15 = vadd.f32 %v140_v13, %v60_v11 }
  0xc6   :  { %v142_v16 = vpop.f32.mrf.mxu1 }
  0xc7   :  { %vm151_vm2 = vcmp.ge.f32.partialorder %v141_v15, 0.0  ;;  %v163_v18 = vmul.f32 %v157_v14, %v141_v15  ;;  %v143_v19 = vadd.f32 %v142_v16, %v60_v11 }
  0xc8   :  { %v146_v20 = vpop.f32.mrf.mxu1 }
  0xc9   :  { %v3002_v21 = vsel %vm151_vm2, %v141_v15, %v163_v18  ;;  %vm152_vm3 = vcmp.ge.f32.partialorder %v143_v19, 0.0  ;;  %v164_v22 = vmul.f32 %v157_v14, %v143_v19  ;;  %v147_v23 = vadd.f32 %v146_v20, %v65_v9 }
  0xca   :  { %v148_v24 = vpop.f32.mrf.mxu1  ;;  %v3005_v25 = vand.u32 4294901760, %v3002_v21  ;;  %v666_v54 = vmul.f32 %v3002_v21, %v3002_v21 }
  0xcb   :  { %v3010_v27 = vsel %vm152_vm3, %v143_v19, %v164_v22  ;;  %vm153_vm4 = vcmp.ge.f32.partialorder %v147_v23, 0.0  ;;  %v165_v28 = vmul.f32 %v161_v10, %v147_v23  ;;  %v149_v29 = vadd.f32 %v148_v24, %v65_v9 }
  0xcc   :  { %v3013_v30 = vand.u32 4294901760, %v3010_v27  ;;  %v302_v37 = vsub.f32 %v3002_v21, %v3005_v25  ;;  %v667_v51 = vmul.f32 %v3010_v27, %v3010_v27  ;;  %v3060_v61 = vand.u32 4294901760, %v666_v54 }
  0xcd   :  { %v3015_v31 = vsel %vm153_vm4, %v147_v23, %v165_v28  ;;  %vm154_vm5 = vcmp.ge.f32.partialorder %v149_v29, 0.0  ;;  %v166_v32 = vmul.f32 %v161_v10, %v149_v29 }
  0xce   :  { %v3018_v33 = vand.u32 4294901760, %v3015_v31  ;;  %v296_v34 = vsub.f32 %v3010_v27, %v3013_v30  ;;  %v303_v44 = vand.u32 4294901760, %v302_v37  ;;  %v668_v48 = vmul.f32 %v3015_v31, %v3015_v31 }
  0xcf   :  { %v3024_v36 = vsel %vm154_vm5, %v149_v29, %v166_v32  ;;  %v3057_v60 = vand.u32 4294901760, %v667_v51  ;;  %v797_v2 = vsub.f32 %v666_v54, %v3060_v61 }
  0xd0   :  { %v3029_v38 = vand.u32 4294901760, %v3024_v36  ;;  %v290_v39 = vsub.f32 %v3015_v31, %v3018_v33  ;;  %v297_v43 = vand.u32 4294901760, %v296_v34  ;;  %v669_v46 = vmul.f32 %v3024_v36, %v3024_v36 }
  0xd1   :  { %v304_v52 = vsub.f32 %v302_v37, %v303_v44  ;;  %v3055_v58 = vand.u32 4294901760, %v668_v48  ;;  %v791_v1 = vsub.f32 %v667_v51, %v3057_v60  ;;  %v798_v10 = vand.u32 4294901760, %v797_v2 }
  0xd2   :  { %204 = vmatprep.subr.mxu1 %v3029_v38  ;;  %v284_v40 = vsub.f32 %v3024_v36, %v3029_v38  ;;  %v291_v42 = vand.u32 4294901760, %v290_v39  ;;  %v298_v50 = vsub.f32 %v296_v34, %v297_v43  ;;  %v3053_v56 = vand.u32 4294901760, %v669_v46 }
  0xd3   :  { %206 = vmatpush1.msra.mxu1 %v3018_v33  ;;  %v305_v59 = vand.u32 4294901760, %v304_v52  ;;  %v785_v0 = vsub.f32 %v668_v48, %v3055_v58  ;;  %v792_v9 = vand.u32 4294901760, %v791_v1  ;;  %v799_v14 = vsub.f32 %v797_v2, %v798_v10 }
  0xd4   :  { %208 = vmatprep.subr.mxu1 %v3013_v30  ;;  %377 = vmatprep.subr.mxu0 %v284_v40  ;;  %v285_v45 = vand.u32 4294901760, %v284_v40  ;;  %v292_v47 = vsub.f32 %v290_v39, %v291_v42  ;;  %v299_v57 = vand.u32 4294901760, %v298_v50  ;;  %v779_v63 = vsub.f32 %v669_v46, %v3053_v56 }
  0xd5   :  { %210 = vmatpush1.msra.mxu1 %v3005_v25  ;;  %380 = vmatpush1.msra.mxu0 %v290_v39  ;;  %v786_v7 = vand.u32 4294901760, %v785_v0  ;;  %v793_v13 = vsub.f32 %v791_v1, %v792_v9  ;;  %v800_v19 = vand.u32 4294901760, %v799_v14 }
  0xd6   :  { %383 = vmatprep.subr.mxu0 %v296_v34  ;;  %249 = vmatmul.mubr.f32.vlgmr.msra.gmra.mxu1 %v3036_v41  ;;  %v286_v49 = vsub.f32 %v284_v40, %v285_v45  ;;  %v293_v55 = vand.u32 4294901760, %v292_v47  ;;  %v780_v6 = vand.u32 4294901760, %v779_v63 }
  0xd7   :  { %386 = vmatpush1.msra.mxu0 %v302_v37  ;;  %339 = vmatprep.mubr.f32.mxu1 %v2900_v3  ;;  %v787_v12 = vsub.f32 %v785_v0, %v786_v7  ;;  %v794_v18 = vand.u32 4294901760, %v793_v13 }
  0xd8   :  { %537 = vmatprep.subr.mxu0 %v285_v45  ;;  %422 = vmatmul.mubr.f32.vlgmr.msra.gmra.mxu0 %v3000_v17  ;;  %v287_v53 = vand.u32 4294901760, %v286_v49  ;;  %v781_v11 = vsub.f32 %v779_v63, %v780_v6 }
  0xd9   :  { %541 = vmatpush1.msra.mxu0 %v291_v42  ;;  %582 = vmatprep.mubr.f32.mxu0 %v2900_v3  ;;  %v788_v16 = vand.u32 4294901760, %v787_v12 }
  0xda   :  { %288 = vmatprep.subr.mxu1 %v287_v53  ;;  %545 = vmatprep.subr.mxu0 %v297_v43  ;;  %v782_v15 = vand.u32 4294901760, %v781_v11 }
  0xdb   :  { %294 = vmatpush1.msra.mxu1 %v293_v55  ;;  %549 = vmatpush1.msra.mxu0 %v303_v44 }
  0xdc   :  { %300 = vmatprep.subr.mxu1 %v299_v57  ;;  %699 = vmatprep.subr.mxu0 %v3053_v56 }
  0xdd   :  { %306 = vmatpush1.msra.mxu1 %v305_v59  ;;  %2791 = vmatmul.mubr.msk.f32.vlgmr.msra.gmra.mxu0 %vm3598_vm1, %v2903_v62 }
  0xde   :  { %701 = vmatpush1.msra.mxu0 %v3055_v58  ;;  %2790 = vmatmul.mubr.msk.f32.vlgmr.msra.gmra.mxu1 %vm3598_vm1, %v2903_v62 }
  0xdf   :  { %457 = vmatprep.subr.mxu1 %v3029_v38  ;;  %703 = vmatprep.subr.mxu0 %v3057_v60 }
  0xe0   :  { %459 = vmatpush1.msra.mxu1 %v3018_v33  ;;  %705 = vmatpush1.msra.mxu0 %v3060_v61 }
  0xe1   :  { %461 = vmatprep.subr.mxu1 %v3013_v30  ;;  %738 = vmatprep.mubr.f32.mxu0 %v2900_v3 }
  0xe2   :  { %872 = vmatprep.subr.mxu0 %v779_v63  ;;  %463 = vmatpush1.msra.mxu1 %v3005_v25 }
  0xe3   :  { %496 = vmatprep.mubr.f32.mxu1 %v2900_v3  ;;  %744 = vmatmul.mubr.f32.vlgmr.msra.gmra.mxu0 %v3036_v41 }
  0xe4   :  { %875 = vmatpush1.msra.mxu0 %v785_v0  ;;  %500 = vmatmul.mubr.f32.vlgmr.msra.gmra.mxu1 %v3008_v26 }
  0xe5   :  { %619 = vmatprep.subr.mxu1 %v3029_v38  ;;  %878 = vmatprep.subr.mxu0 %v791_v1 }
  0xe6   :  { %621 = vmatpush1.msra.mxu1 %v3018_v33  ;;  %881 = vmatpush1.msra.mxu0 %v797_v2 }
  0xe7   :  { %623 = vmatprep.subr.mxu1 %v3013_v30  ;;  %914 = vmatprep.mubr.f32.mxu0 %v2900_v3 }
  0xe8   :  { %1032 = vmatprep.subr.mxu0 %v780_v6  ;;  %625 = vmatpush1.msra.mxu1 %v3005_v25 }
  0xe9   :  { %658 = vmatprep.mubr.f32.mxu1 %v2900_v3  ;;  %917 = vmatmul.mubr.f32.vlgmr.msra.gmra.mxu0 %v3000_v17 }
  0xea   :  { %1036 = vmatpush1.msra.mxu0 %v786_v7  ;;  %2792 = vmatmul.mubr.msk.f32.vlgmr.msra.gmra.mxu1 %vm3598_vm1, %v2903_v62 }
  0xeb   :  { %783 = vmatprep.subr.mxu1 %v782_v15  ;;  %1040 = vmatprep.subr.mxu0 %v792_v9  ;;  %v1174_v15 = vlaneseq }
  0xec   :  { %789 = vmatpush1.msra.mxu1 %v788_v16  ;;  %1044 = vmatpush1.msra.mxu0 %v798_v10  ;;  %v3118_v16 = vld [vmem:[%s3586_s1] sm:$0x3]  ;;  %s2905_s1 = smov 2  }
  0xed   :  { %795 = vmatprep.subr.mxu1 %v794_v18  ;;  %834 = vmatprep.mubr.f32.mxu1 %v2900_v3  ;;  %v1181_v18 = vshrl.u32 %v1174_v15, 7  ;;  %vm45_vm7 = vcmp.ge.s32.totalorder %v3118_v16, 1  ;;  %vm46_vm11 = vcmp.ge.s32.totalorder %v3118_v16, 2  ;;  %vm47_vm15 = vcmp.ge.s32.totalorder %v3118_v16, 4 }
  0xee   :  { %801 = vmatpush1.msra.mxu1 %v800_v19  ;;  %1077 = vmatprep.mubr.f32.mxu0 %v2900_v3  ;;  %vm48_vm4 = vcmp.ge.s32.totalorder %v3118_v16, 8 }
  0xef   :  { %2793 = vmatmul.mubr.msk.f32.vlgmr.msra.gmra.mxu1 %vm3598_vm1, %v2903_v62  ;;  %952 = vmatprep.subr.mxu1 %v3053_v56  ;;  %v3121_v19 = vsub.s32 0, %v1181_v18 }
  0xf0   :  { %954 = vmatpush1.msra.mxu1 %v3055_v58  ;;  %991 = vmatprep.mubr.f32.mxu1 %v2900_v3 }
  0xf1   :  { %956 = vmatprep.subr.mxu1 %v3057_v60  ;;  %2794 = vmatmul.mubr.msk.f32.vlgmr.msra.gmra.mxu0 %vm3598_vm1, %v2903_v62 }
  0xf2   :  { %958 = vmatpush1.msra.mxu1 %v3060_v61  ;;  %1581 = vmatprep.mubr.f32.mxu0 %v2900_v3 }
  0xf3   :  { %995 = vmatmul.mubr.f32.vlgmr.msra.gmra.mxu1 %v3008_v26  ;;  %1114 = vmatprep.subr.mxu1 %v3053_v56 }
  0xf4   :  { %1116 = vmatpush1.msra.mxu1 %v3055_v58  ;;  %1153 = vmatprep.mubr.f32.mxu1 %v2900_v3 }
  0xf5   :  { %1118 = vmatprep.subr.mxu1 %v3057_v60 }
  0xf6   :  { %1120 = vmatpush1.msra.mxu1 %v3060_v61 }
  0xf7   :  { %2795 = vmatmul.mubr.msk.f32.vlgmr.msra.gmra.mxu1 %vm3598_vm1, %v2903_v62 }
  0xf8   :  { %1677 = vmatprep.mubr.f32.mxu1 %v2900_v3 }
 0x196   :  { %v250_v20 = vpop.f32.mrf.mxu1 }
 0x198   :  { %v423_v22 = vpop.f32.mrf.mxu0  ;;  %v252_v24 = vpop.f32.mrf.mxu1 }
 0x19a   :  { %v425_v23 = vpop.f32.mrf.mxu0 }
 0x19d   :  { %v585_v25 = vpop.f32.mrf.mxu0 }
 0x19e   :  { %v342_v28 = vpop.f32.mrf.mxu1 }
 0x19f   :  { %v587_v29 = vpop.f32.mrf.mxu0  ;;  %v343_v37 = vadd.f32 %v342_v28, %v250_v20  ;;  %v3123_v20 = vsub.s32 1, %v1181_v18 }
 0x1a0   :  { %v344_v30 = vpop.f32.mrf.mxu1 }
 0x1a1   :  { %v345_v40 = vadd.f32 %v344_v30, %v252_v24  ;;  %v424_v43 = vadd.f32 %v423_v22, %v343_v37  ;;  %v1179_v22 = vsel %vm45_vm7, 1, %v2901_v5 }
 0x1a2   :  { %v1183_v24 = vrot.slane %v1179_v22, %v3121_v19 }
 0x1a3   :  { %v745_v32 = vpop.f32.mrf.mxu0  ;;  %v426_v46 = vadd.f32 %v425_v23, %v345_v40  ;;  %v3126_v23 = vand.u32 127, %v1174_v15  ;;  %v1201_v40 = vsel %vm46_vm11, 1, %v2901_v5 }
 0x1a4   :  { %v501_v33 = vpop.f32.mrf.mxu1  ;;  %vm3131_vm9 = vcmp.eq.s32.totalorder %v1183_v24, 1 }
 0x1a5   :  { %v747_v35 = vpop.f32.mrf.mxu0  ;;  %v502_v49 = vadd.f32 %v501_v33, %v424_v43  ;;  %vm3595_vm8 = vcmp.lt.s32.totalorder %v3126_v23, 1  ;;  %v1209_v43 = vrot.slane %v1201_v40, %v3123_v20  ;;  %vm3600_vm12 = vcmp.lt.s32.totalorder %v3126_v23, 2 }
 0x1a6   :  { %v503_v34 = vpop.f32.mrf.mxu1  ;;  %vm3601_vm0 = vcmp.lt.s32.totalorder %v3126_v23, 4  ;;  %vm3594_vm5 = vcmp.lt.s32.totalorder %v3126_v23, 8 }
 0x1a7   :  { %v504_v54 = vadd.f32 %v503_v34, %v426_v46  ;;  %v586_v58 = vadd.f32 %v585_v25, %v502_v49  ;;  %v1187_v25 = vrot.slane %v1179_v22, %v3123_v20  ;;  %vm3158_vm14 = vcmp.eq.s32.totalorder %v1209_v43, 1 }
 0x1a9   :  { %v918_v39 = vpop.f32.mrf.mxu0  ;;  %v588_v0 = vadd.f32 %v587_v29, %v504_v54  ;;  %vm3135_vm10 = vcmp.eq.s32.totalorder %v1187_v25, 1  ;;  %v1223_v54 = vsel %vm47_vm15, 1, %v2901_v5  ;;  %vm49_vm15 = vcmp.ge.s32.totalorder %v3118_v16, 16 }
 0x1aa   :  { %v661_v38 = vpop.f32.mrf.mxu1 }
 0x1ab   :  { %v920_v45 = vpop.f32.mrf.mxu0  ;;  %v662_v7 = vadd.f32 %v661_v38, %v586_v58 }
 0x1ac   :  { %v663_v42 = vpop.f32.mrf.mxu1 }
 0x1ad   :  { %v664_v11 = vadd.f32 %v663_v42, %v588_v0  ;;  %v1205_v42 = vrot.slane %v1201_v40, %v3121_v19 }
 0x1af   :  { %v837_v44 = vpop.f32.mrf.mxu1  ;;  %vm3154_vm13 = vcmp.eq.s32.totalorder %v1205_v42, 1 }
 0x1b0   :  { %v838_v47 = vadd.f32 %v837_v44, %v745_v32 }
 0x1b1   :  { %v839_v48 = vpop.f32.mrf.mxu1  ;;  %v1080_v53 = vpop.f32.mrf.mxu0 }
 0x1b2   :  { %v919_v50 = vadd.f32 %v918_v39, %v838_v47  ;;  %v840_v51 = vadd.f32 %v839_v48, %v747_v35 }
 0x1b3   :  { %v996_v52 = vpop.f32.mrf.mxu1  ;;  %v1082_v61 = vpop.f32.mrf.mxu0 }
 0x1b4   :  { %v921_v55 = vadd.f32 %v920_v45, %v840_v51  ;;  %v997_v56 = vadd.f32 %v996_v52, %v919_v50 }
 0x1b5   :  { %v998_v57 = vpop.f32.mrf.mxu1 }
 0x1b6   :  { %v1081_v59 = vadd.f32 %v1080_v53, %v997_v56  ;;  %v999_v60 = vadd.f32 %v998_v57, %v921_v55  ;;  %v1227_v55 = vrot.slane %v1223_v54, %v3121_v19  ;;  %v1231_v56 = vrot.slane %v1223_v54, %v3123_v20  ;;  %v42_v54 = vld [vmem:[%s3591_s6] sm:$0xff] }
 0x1b7   :  { %v1156_v63 = vpop.f32.mrf.mxu1 }
 0x1b8   :  { %v1083_v1 = vadd.f32 %v1082_v61, %v999_v60  ;;  %v1157_v2 = vadd.f32 %v1156_v63, %v1081_v59  ;;  %vm3177_vm2 = vcmp.eq.s32.totalorder %v1227_v55, 1  ;;  %vm3181_vm3 = vcmp.eq.s32.totalorder %v1231_v56, 1 }
 0x1b9   :  { %v1158_v6 = vpop.f32.mrf.mxu1 }
 0x1ba   :  { %v1163_v9 = vrot.slane %v1157_v2, 7  ;;  %v1159_v10 = vadd.f32 %v1158_v6, %v1083_v1 }
 0x1bc   :  { %v1164_v12 = vrot.slane %v1159_v10, 7  ;;  %v1168_v13 = vsel %vm3597_vm6, %v662_v7, %v1163_v9  ;;  %v1245_v7 = vsel %vm48_vm4, 1, %v2901_v5  ;;  %vm3596_vm4 = vcmp.lt.s32.totalorder %v3126_v23, 16 }
 0x1bd   :  { %1170 = vrot.lane.b32.xlu0 %v1168_v13, %s2904_s2  ;;  %v1249_v9 = vrot.slane %v1245_v7, %v3121_v19  ;;  %v1253_v10 = vrot.slane %v1245_v7, %v3123_v20  ;;  %v2913_v7 = vmov 3  }
 0x1be   :  { %v1169_v14 = vsel %vm3597_vm6, %v664_v11, %v1164_v12 }
 0x1bf   :  { %1172 = vrot.lane.b32.xlu1 %v1169_v14, %s2904_s2  ;;  %vm3200_vm7 = vcmp.eq.s32.totalorder %v1249_v9, 1  ;;  %vm3204_vm11 = vcmp.eq.s32.totalorder %v1253_v10, 1  ;;  %v37_v9 = vld [vmem:[%s3589_s4] sm:$0xff]  ;;  %v2914_v10 = vmov 7  }
 0x22f   :  { %v1171_v30 = vpop.permute.xlu0 %1170 }
 0x231   :  { %v1173_v32 = vpop.permute.xlu1 %1172 }
 0x232   :  { %v1177_v33 = vsel %vm3595_vm8, %v1171_v30, %v1173_v32  ;;  %v1178_v34 = vsel %vm3595_vm8, %v1173_v32, %v1171_v30  ;;  %v1267_v32 = vsel %vm49_vm15, 1, %v2901_v5  ;;  %vm50_vm15 = vcmp.ge.s32.totalorder %v3118_v16, 32 }
 0x233   :  { %v1190_v35 = vsel %vm3131_vm9, %v1178_v34, 0.0  ;;  %v1191_v37 = vsel %vm3135_vm10, %v1177_v33, 0.0  ;;  %v1271_v33 = vrot.slane %v1267_v32, %v3121_v19  ;;  %v1275_v34 = vrot.slane %v1267_v32, %v3123_v20 }
 0x234   :  { %v1192_v38 = vadd.f32 %v1190_v35, %v1168_v13  ;;  %v1193_v39 = vadd.f32 %v1191_v37, %v1169_v14  ;;  %v2909_v35 = vmov 1  }
 0x235   :  { %2828 = vset.pattern.permute.xlu1 %v2909_v35  ;;  %2827 = vset.pattern.permute.xlu0 %v2909_v35  ;;  %vm3227_vm8 = vcmp.eq.s32.totalorder %v1275_v34, 1 }
 0x236   :  { %1194 = vrot.lane.b32.xlu0 %v1192_v38, %s2905_s1  ;;  %1196 = vrot.lane.b32.xlu1 %v1193_v39, %s2905_s1 }
 0x2a8   :  { %v1195_v46 = vpop.permute.xlu0 %1194  ;;  %v1197_v47 = vpop.permute.xlu1 %1196 }
 0x2a9   :  { %v1199_v48 = vsel %vm3600_vm12, %v1195_v46, %v1197_v47  ;;  %v1200_v49 = vsel %vm3600_vm12, %v1197_v47, %v1195_v46 }
 0x2aa   :  { %v1212_v50 = vsel %vm3154_vm13, %v1200_v49, 0.0  ;;  %v1213_v51 = vsel %vm3158_vm14, %v1199_v48, 0.0 }
 0x2ab   :  { %v1214_v52 = vadd.f32 %v1212_v50, %v1192_v38  ;;  %v1215_v53 = vadd.f32 %v1213_v51, %v1193_v39  ;;  %v1289_v50 = vsel %vm50_vm15, 1, %v2901_v5  ;;  %vm51_vm15 = vcmp.ge.s32.totalorder %v3118_v16, 64 }
 0x2ac   :  { %v1293_v51 = vrot.slane %v1289_v50, %v3121_v19 }
 0x2ad   :  { %1216 = vrot.lane.b32.xlu0 %v1214_v52, %s2906_s19  ;;  %1218 = vrot.lane.b32.xlu1 %v1215_v53, %s2906_s19 }
 0x2ae   :  { %vm3246_vm6 = vcmp.eq.s32.totalorder %v1293_v51, 1 }
 0x31f   :  { %v1217_v59 = vpop.permute.xlu0 %1216  ;;  %v1219_v60 = vpop.permute.xlu1 %1218 }
 0x320   :  { %v1221_v61 = vsel %vm3601_vm0, %v1217_v59, %v1219_v60  ;;  %v1222_v63 = vsel %vm3601_vm0, %v1219_v60, %v1217_v59 }
 0x321   :  { %v1234_v0 = vsel %vm3177_vm2, %v1222_v63, 0.0  ;;  %v1235_v1 = vsel %vm3181_vm3, %v1221_v61, 0.0 }
 0x322   :  { %v1236_v2 = vadd.f32 %v1234_v0, %v1214_v52  ;;  %v1237_v6 = vadd.f32 %v1235_v1, %v1215_v53  ;;  %v1297_v52 = vrot.slane %v1289_v50, %v3123_v20  ;;  %v2916_v53 = vmov 5  }
 0x324   :  { %1238 = vrot.lane.b32.xlu0 %v1236_v2, %s2907_s20  ;;  %1240 = vrot.lane.b32.xlu1 %v1237_v6, %s2907_s20  ;;  %vm3250_vm1 = vcmp.eq.s32.totalorder %v1297_v52, 1 }
 0x396   :  { %v1239_v13 = vpop.permute.xlu0 %1238  ;;  %v1241_v14 = vpop.permute.xlu1 %1240 }
 0x397   :  { %v1243_v15 = vsel %vm3594_vm5, %v1239_v13, %v1241_v14  ;;  %v1244_v18 = vsel %vm3594_vm5, %v1241_v14, %v1239_v13  ;;  %vm3223_vm5 = vcmp.eq.s32.totalorder %v1271_v33, 1  ;;  %v52_v13 = vcvt.s32.f32 %v3118_v16 }
 0x398   :  { %v1256_v22 = vsel %vm3200_vm7, %v1244_v18, 0.0  ;;  %v1257_v24 = vsel %vm3204_vm11, %v1243_v15, 0.0  ;;  %v1311_v18 = vsel %vm51_vm15, 1, %v2901_v5  ;;  %vm3633_vm15 = vcmp.lt.s32.totalorder %v3126_v23, 4 }
 0x399   :  { %v1258_v25 = vadd.f32 %v1256_v22, %v1236_v2  ;;  %v1259_v30 = vadd.f32 %v1257_v24, %v1237_v6  ;;  %v2912_v2 = vmov 2   ;;  %v38_v6 = vld [vmem:[%s3589_s4 + $0x8] sm:$0xff]  ;;  %v53_v14 = vadd.f32 1.0, %v52_v13 }
 0x39a   :  { %v1315_v22 = vrot.slane %v1311_v18, %v3121_v19  ;;  %v1319_v24 = vrot.slane %v1311_v18, %v3123_v20 }
 0x39b   :  { %1260 = vrot.lane.b32.xlu0 %v1258_v25, %s2908_s21  ;;  %1262 = vrot.lane.b32.xlu1 %v1259_v30, %s2908_s21  ;;  %v54_v15 = vmul.f32 16.0, %v53_v14 }
 0x39c   :  { %vm3285_vm12 = vcmp.eq.s32.totalorder %v1315_v22, 1  ;;  %vm3289_vm0 = vcmp.eq.s32.totalorder %v1319_v24, 1 }
 0x39d   :  { %2842 = vrcp.f32 %v54_v15 }
 0x40d   :  { %v1261_v39 = vpop.permute.xlu0 %1260  ;;  %v1263_v40 = vpop.permute.xlu1 %1262 }
 0x40e   :  { %v1265_v42 = vsel %vm3596_vm4, %v1261_v39, %v1263_v40  ;;  %v1266_v43 = vsel %vm3596_vm4, %v1263_v40, %v1261_v39  ;;  %vm3599_vm4 = vcmp.lt.s32.totalorder %v3126_v23, 32 }
 0x40f   :  { %v1278_v46 = vsel %vm3223_vm5, %v1266_v43, 0.0  ;;  %v1279_v47 = vsel %vm3227_vm8, %v1265_v42, 0.0 }
 0x410   :  { %v1280_v48 = vadd.f32 %v1278_v46, %v1258_v25  ;;  %v1281_v49 = vadd.f32 %v1279_v47, %v1259_v30  ;;  %v3629_v25 = vmov 0  ;;  %v3631_v30 = vmov 0 }
 0x411   :  { %v3630_v25 = vsel %vm3285_vm12, 4294967295, %v3629_v25  ;;  %v3632_v30 = vsel %vm3289_vm0, 4294967295, %v3631_v30 }
 0x412   :  { %1282 = vrot.lane.b32.xlu0 %v1280_v48, %s2910_s22  ;;  %1284 = vrot.lane.b32.xlu1 %v1281_v49, %s2910_s22 }
 0x484   :  { %v1283_v55 = vpop.permute.xlu0 %1282  ;;  %v1285_v56 = vpop.permute.xlu1 %1284 }
 0x485   :  { %v1287_v59 = vsel %vm3599_vm4, %v1283_v55, %v1285_v56  ;;  %v1288_v60 = vsel %vm3599_vm4, %v1285_v56, %v1283_v55  ;;  %vm3602_vm4 = vcmp.lt.s32.totalorder %v3126_v23, 64 }
 0x486   :  { %v1300_v61 = vsel %vm3246_vm6, %v1288_v60, 0.0  ;;  %v1301_v63 = vsel %vm3250_vm1, %v1287_v59, 0.0 }
 0x487   :  { %v1302_v0 = vadd.f32 %v1300_v61, %v1280_v48  ;;  %v1303_v1 = vadd.f32 %v1301_v63, %v1281_v49 }
 0x489   :  { %1304 = vrot.lane.b32.xlu0 %v1302_v0, %s2911_s23  ;;  %1306 = vrot.lane.b32.xlu1 %v1303_v1, %s2911_s23 }
 0x48d   :  { %1380 = vperm.xlu1 %2828, %v2990_v8   ;;  %1384 = vperm.xlu0 %2827, %v2978_v4  }
 0x491   :  { %2829 = vset.pattern.permute.xlu1 %v2912_v2  ;;  %2830 = vset.pattern.permute.xlu0 %v2912_v2 }
 0x492   :  { %1396 = vperm.xlu1 %2829, %v2978_v4   ;;  %1392 = vperm.xlu0 %2830, %v2990_v8  }
 0x496   :  { %1410 = vperm.xlu1 %2829, %v38_v6   ;;  %2831 = vset.pattern.permute.xlu0 %v2913_v7 }
 0x497   :  { %1422 = vperm.xlu0 %2831, %v2978_v4  }
 0x49a   :  { %1405 = vperm.xlu1 %2829, %v37_v9  }
 0x49b   :  { %2834 = vset.pattern.permute.xlu0 %v2901_v5 }
 0x49c   :  { %1446 = vperm.xlu0 %2834, %v37_v9  }
 0x49e   :  { %2832 = vset.pattern.permute.xlu1 %v2901_v5 }
 0x49f   :  { %1450 = vperm.xlu1 %2832, %v38_v6  }
 0x4a0   :  { %2836 = vset.pattern.permute.xlu0 %v2914_v10 }
 0x4a1   :  { %1502 = vperm.xlu0 %2836, %v2978_v4   ;;  %v2843_v4 = vpop.eup %2842 }
 0x4a2   :  { %v3294_v16 = vrot.slane %v2843_v4, %v3121_v19  ;;  %v3297_v34 = vrot.slane %v2843_v4, %v3123_v20 }
 0x4a3   :  { %2833 = vset.pattern.permute.xlu1 %v2913_v7 }
 0x4a4   :  { %1418 = vperm.xlu1 %2833, %v2990_v8  }
 0x4a8   :  { %2835 = vset.pattern.permute.xlu1 %v2909_v35 }
 0x4a9   :  { %1482 = vperm.xlu1 %2835, %v38_v6  }
 0x4ad   :  { %1478 = vperm.xlu1 %2835, %v37_v9  }
 0x4fb   :  { %v1305_v32 = vpop.permute.xlu0 %1304  ;;  %v1307_v33 = vpop.permute.xlu1 %1306 }
 0x4fc   :  { %v1309_v35 = vsel %vm3602_vm4, %v1305_v32, %v1307_v33  ;;  %v1310_v39 = vsel %vm3602_vm4, %v1307_v33, %v1305_v32  ;;  %vm3634_vm4 = vmmov %vm3633_vm15 }
 0x4fd   :  { %v1322_v40 = vsel %vm3285_vm12, %v1310_v39, 0.0  ;;  %v1323_v42 = vsel %vm3289_vm0, %v1309_v35, 0.0  ;;  %vm3635_vm0 = vmmov %vm3634_vm4 }
 0x4fe   :  { %v1324_v43 = vadd.f32 %v1322_v40, %v1302_v0  ;;  %v1325_v46 = vadd.f32 %v1323_v42, %v1303_v1  ;;  %vm3636_vm12 = vmmov %vm3635_vm0 }
 0x500   :  { %v1337_v47 = vmul.f32 %v3294_v16, %v1324_v43  ;;  %v1338_v48 = vmul.f32 %v3297_v34, %v1325_v46 }
 0x502   :  { %v1339_v49 = vmul.f32 %v1337_v47, %v1337_v47  ;;  %v1340_v50 = vmul.f32 %v1338_v48, %v1338_v48  ;;  %v1358_v2 = vrot.slane %v1337_v47, %v3121_v19  ;;  %v1362_v0 = vrot.slane %v1338_v48, %v3121_v19 }
 0x504   :  { %v1343_v51 = vrot.slane %v1339_v49, 7  ;;  %v1344_v52 = vrot.slane %v1340_v50, 7  ;;  %v1365_v10 = vsub.f32 %v3015_v31, %v1358_v2  ;;  %v1363_v13 = vsub.f32 %v3002_v21, %v1358_v2 }
 0x505   :  { %v1364_v14 = vsub.f32 %v3010_v27, %v1362_v0  ;;  %v1366_v22 = vsub.f32 %v3024_v36, %v1362_v0 }
 0x506   :  { %v1347_v55 = vsub.f32 %v1337_v47, %v1343_v51  ;;  %v1348_v56 = vsub.f32 %v1338_v48, %v1344_v52 }
 0x508   :  { %v1349_v59 = vmax.f32 %v1347_v55, 0.0  ;;  %v1350_v60 = vmax.f32 %v1348_v56, 0.0  ;;  %v1381_v6 = vpop.permute.xlu1 %1380  ;;  %v1385_v18 = vpop.permute.xlu0 %1384 }
 0x50a   :  { %v1351_v61 = vadd.f32 1e-10, %v1349_v59  ;;  %v1352_v63 = vadd.f32 1e-10, %v1350_v60 }
 0x50c   :  { %2844 = vrsqrt.f32 %v1351_v61 }
 0x50d   :  { %2846 = vrsqrt.f32 %v1352_v63  ;;  %v1397_v39 = vpop.permute.xlu1 %1396  ;;  %v1393_v47 = vpop.permute.xlu0 %1392 }
 0x511   :  { %v1411_v36 = vpop.permute.xlu1 %1410 }
 0x512   :  { %v1423_v50 = vpop.permute.xlu0 %1422 }
 0x515   :  { %v1406_v48 = vpop.permute.xlu1 %1405 }
 0x517   :  { %v1447_v52 = vpop.permute.xlu0 %1446 }
 0x519   :  { %v2845_v1 = vpop.eup %2844 }
 0x51a   :  { %v2847_v7 = vpop.eup %2846  ;;  %v1370_v9 = vrot.slane %v2845_v1, %v3123_v20  ;;  %v1451_v49 = vpop.permute.xlu1 %1450 }
 0x51b   :  { %v1374_v15 = vrot.slane %v2847_v7, %v3123_v20 }
 0x51c   :  { %v1377_v24 = vmul.f32 %v1370_v9, %v1365_v10  ;;  %v1375_v4 = vmul.f32 %v1370_v9, %v1363_v13  ;;  %v1503_v56 = vpop.permute.xlu0 %1502 }
 0x51d   :  { %v1376_v32 = vmul.f32 %v1374_v15, %v1364_v14  ;;  %v1378_v33 = vmul.f32 %v1374_v15, %v1366_v22 }
 0x51e   :  { %v1389_v35 = vmul.f32 %v1385_v18, %v1377_v24  ;;  %v1387_v46 = vmul.f32 %v1381_v6, %v1375_v4 }
 0x51f   :  { %v1390_v40 = vmul.f32 %v1385_v18, %v1378_v33  ;;  %v1388_v42 = vmul.f32 %v1381_v6, %v1376_v32  ;;  %v1419_v51 = vpop.permute.xlu1 %1418 }
 0x520   :  { %v1401_v43 = vadd.f32 %v1397_v39, %v1389_v35  ;;  %v1399_v27 = vadd.f32 %v1393_v47, %v1387_v46 }
 0x521   :  { %v1402_v31 = vadd.f32 %v1397_v39, %v1390_v40  ;;  %v1400_v21 = vadd.f32 %v1393_v47, %v1388_v42 }
 0x522   :  { %1431 = vrot.lane.b32.xlu1 %v1401_v43, %s2906_s19  ;;  %v1415_v0 = vmul.f32 %v1411_v36, %v1401_v43  ;;  %v1413_v40 = vmul.f32 %v1406_v48, %v1399_v27 }
 0x523   :  { %1435 = vrot.lane.b32.xlu0 %v1402_v31, %s2906_s19  ;;  %v1416_v1 = vmul.f32 %v1411_v36, %v1402_v31  ;;  %v1414_v42 = vmul.f32 %v1406_v48, %v1400_v21 }
 0x524   :  { %v1483_v55 = vpop.permute.xlu1 %1482  ;;  %v1427_v22 = vadd.f32 %v1423_v50, %v1415_v0 }
 0x525   :  { %v1428_v24 = vadd.f32 %v1423_v50, %v1416_v1  ;;  %v1426_v0 = vadd.f32 %v1419_v51, %v1414_v42 }
 0x526   :  { %1433 = vrot.lane.b32.xlu1 %v1400_v21, %s2906_s19 }
 0x527   :  { %1429 = vrot.lane.b32.xlu0 %v1399_v27, %s2906_s19 }
 0x528   :  { %v1479_v59 = vpop.permute.xlu1 %1478 }
 0x52a   :  { %1467 = vrot.lane.b32.xlu1 %v1402_v31, %s2905_s1 }
 0x52b   :  { %1463 = vrot.lane.b32.xlu0 %v1401_v43, %s2905_s1 }
 0x52e   :  { %1461 = vrot.lane.b32.xlu1 %v1399_v27, %s2905_s1 }
 0x52f   :  { %1498 = vperm.xlu0 %2836, %v2990_v8  }
 0x532   :  { %1465 = vrot.lane.b32.xlu1 %v1400_v21, %s2905_s1 }
 0x594   :  { %v1432_v60 = vpop.permute.xlu1 %1431 }
 0x595   :  { %v1436_v61 = vpop.permute.xlu0 %1435 }
 0x596   :  { %v1438_v63 = vsel %vm3633_vm15, %v1432_v60, %v1436_v61  ;;  %v1440_v2 = vsel %vm3634_vm4, %v1436_v61, %v1432_v60  ;;  %vm3637_vm4 = vcmp.lt.s32.totalorder %v3126_v23, 2 }
 0x597   :  { %v1443_v6 = vsel %vm3177_vm2, %v1440_v2, 0.0  ;;  %v1444_v7 = vsel %vm3181_vm3, %v1438_v63, 0.0 }
 0x598   :  { %v1434_v8 = vpop.permute.xlu1 %1433  ;;  %v1455_v14 = vmul.f32 %v1451_v49, %v1443_v6  ;;  %v1456_v15 = vmul.f32 %v1451_v49, %v1444_v7 }
 0x599   :  { %v1430_v9 = vpop.permute.xlu0 %1429 }
 0x59a   :  { %v1437_v10 = vsel %vm3635_vm0, %v1430_v9, %v1434_v8  ;;  %v1439_v13 = vsel %vm3636_vm12, %v1434_v8, %v1430_v9  ;;  %vm3638_vm0 = vmmov %vm3637_vm4  ;;  %v1459_v31 = vadd.f32 %v1455_v14, %v1427_v22  ;;  %v1460_v47 = vadd.f32 %v1456_v15, %v1428_v24 }
 0x59b   :  { %v1441_v32 = vsel %vm3177_vm2, %v1439_v13, 0.0  ;;  %v1442_v33 = vsel %vm3181_vm3, %v1437_v10, 0.0  ;;  %v1425_v8 = vadd.f32 %v1419_v51, %v1413_v40 }
 0x59c   :  { %v1468_v18 = vpop.permute.xlu1 %1467  ;;  %v1453_v60 = vmul.f32 %v1447_v52, %v1441_v32  ;;  %v1454_v61 = vmul.f32 %v1447_v52, %v1442_v33 }
 0x59d   :  { %v1464_v4 = vpop.permute.xlu0 %1463 }
 0x59e   :  { %v1470_v35 = vsel %vm3637_vm4, %v1464_v4, %v1468_v18  ;;  %v1472_v39 = vsel %vm3638_vm0, %v1468_v18, %v1464_v4  ;;  %v1457_v1 = vadd.f32 %v1453_v60, %v1425_v8  ;;  %v1458_v6 = vadd.f32 %v1454_v61, %v1426_v0  ;;  %vm3639_vm4 = vmmov %vm3638_vm0 }
 0x59f   :  { %v1475_v43 = vsel %vm3154_vm13, %v1472_v39, 0.0  ;;  %v1476_v46 = vsel %vm3158_vm14, %v1470_v35, 0.0 }
 0x5a0   :  { %v1487_v36 = vmul.f32 %v1483_v55, %v1475_v43  ;;  %v1488_v49 = vmul.f32 %v1483_v55, %v1476_v46  ;;  %v1462_v50 = vpop.permute.xlu1 %1461 }
 0x5a2   :  { %v1491_v63 = vadd.f32 %v1487_v36, %v1459_v31  ;;  %v1492_v2 = vadd.f32 %v1488_v49, %v1460_v47 }
 0x5a4   :  { %vm1495_vm12 = vcmp.ge.f32.partialorder %v1491_v63, 0.0  ;;  %vm1496_vm15 = vcmp.ge.f32.partialorder %v1492_v2, 0.0  ;;  %v1507_v21 = vmul.f32 %v1503_v56, %v1491_v63  ;;  %v1508_v27 = vmul.f32 %v1503_v56, %v1492_v2  ;;  %v1466_v48 = vpop.permute.xlu1 %1465 }
 0x5a5   :  { %v1469_v7 = vsel %vm3639_vm4, %v1462_v50, %v1466_v48  ;;  %v1471_v55 = vsel %vm3638_vm0, %v1466_v48, %v1462_v50  ;;  %vm3640_vm4 = vcmask 130048  }
 0x5a6   :  { %v3354_v9 = vsel %vm1495_vm12, %v1491_v63, %v1507_v21  ;;  %v3356_v52 = vsel %vm1496_vm15, %v1492_v2, %v1508_v27  ;;  %v1473_v51 = vsel %vm3154_vm13, %v1471_v55, 0.0  ;;  %v1474_v10 = vsel %vm3158_vm14, %v1469_v7, 0.0  ;;  %vm3641_vm0 = vmmov %vm3640_vm4 }
 0x5a7   :  { %v1485_v56 = vmul.f32 %v1479_v59, %v1473_v51  ;;  %v1486_v13 = vmul.f32 %v1479_v59, %v1474_v10  ;;  %v3363_v14 = vand.u32 4294901760, %v3356_v52  ;;  %v3366_v15 = vand.u32 4294901760, %v3354_v9 }
 0x5a8   :  { %v2007_v61 = vmul.f32 %v3356_v52, %v3356_v52  ;;  %v2006_v8 = vmul.f32 %v3354_v9, %v3354_v9 }
 0x5a9   :  { %v1489_v18 = vadd.f32 %v1485_v56, %v1457_v1  ;;  %v1490_v22 = vadd.f32 %v1486_v13, %v1458_v6  ;;  %1542 = vmatprep.subr.mxu0 %v3363_v14  ;;  %v1622_v24 = vsub.f32 %v3356_v52, %v3363_v14  ;;  %v1628_v4 = vsub.f32 %v3354_v9, %v3366_v15 }
 0x5aa   :  { %v1499_v32 = vpop.permute.xlu0 %1498  ;;  %1544 = vmatpush1.msra.mxu0 %v3366_v15  ;;  %v3400_v1 = vand.u32 4294901760, %v2007_v61  ;;  %v3402_v55 = vand.u32 4294901760, %v2006_v8 }
 0x5ab   :  { %vm1493_vm12 = vcmp.ge.f32.partialorder %v1489_v18, 0.0  ;;  %vm1494_vm15 = vcmp.ge.f32.partialorder %v1490_v22, 0.0  ;;  %v1505_v59 = vmul.f32 %v1499_v32, %v1489_v18  ;;  %v1506_v33 = vmul.f32 %v1499_v32, %v1490_v22 }
 0x5ac   :  { %v1623_v35 = vand.u32 4294901760, %v1622_v24  ;;  %v1629_v39 = vand.u32 4294901760, %v1628_v4  ;;  %v2117_v56 = vsub.f32 %v2007_v61, %v3400_v1  ;;  %v2123_v13 = vsub.f32 %v2006_v8, %v3402_v55 }
 0x5ad   :  { %v3374_v40 = vsel %vm1493_vm12, %v1489_v18, %v1505_v59  ;;  %v3376_v42 = vsel %vm1494_vm15, %v1490_v22, %v1506_v33  ;;  %vm3642_vm12 = vmmov %vm3641_vm0 }
 0x5ae   :  { %v3379_v43 = vand.u32 4294901760, %v3376_v42  ;;  %v1624_v46 = vsub.f32 %v1622_v24, %v1623_v35  ;;  %v3382_v31 = vand.u32 4294901760, %v3374_v40  ;;  %v1630_v47 = vsub.f32 %v1628_v4, %v1629_v39  ;;  %vm3643_vm15 = vmmov %vm3641_vm0 }
 0x5af   :  { %v2005_v0 = vmul.f32 %v3376_v42, %v3376_v42  ;;  %v2004_v48 = vmul.f32 %v3374_v40, %v3374_v40 }
 0x5b0   :  { %1546 = vmatprep.subr.mxu0 %v3379_v43  ;;  %v1625_v36 = vand.u32 4294901760, %v1624_v46  ;;  %v1631_v49 = vand.u32 4294901760, %v1630_v47  ;;  %v1634_v50 = vsub.f32 %v3376_v42, %v3379_v43  ;;  %v1640_v60 = vsub.f32 %v3374_v40, %v3382_v31 }
 0x5b1   :  { %1548 = vmatpush1.msra.mxu0 %v3382_v31  ;;  %v3405_v51 = vand.u32 4294901760, %v2005_v0  ;;  %v3407_v10 = vand.u32 4294901760, %v2004_v48 }
 0x5b2   :  { %1626 = vmatprep.subr.mxu1 %v1625_v36  ;;  %1715 = vmatprep.subr.mxu0 %v1622_v24  ;;  %v1635_v63 = vand.u32 4294901760, %v1634_v50  ;;  %v1641_v2 = vand.u32 4294901760, %v1640_v60  ;;  %v2118_v24 = vand.u32 4294901760, %v2117_v56 }
 0x5b3   :  { %1632 = vmatpush1.msra.mxu1 %v1631_v49  ;;  %1587 = vmatmul.mubr.f32.vlgmr.msra.gmra.mxu0 %v3036_v41  ;;  %v2129_v18 = vsub.f32 %v2005_v0, %v3405_v51  ;;  %v2135_v22 = vsub.f32 %v2004_v48, %v3407_v10 }
 0x5b4   :  { %1718 = vmatpush1.msra.mxu0 %v1628_v4  ;;  %1757 = vmatprep.mubr.f32.mxu0 %v2900_v3  ;;  %v1636_v21 = vsub.f32 %v1634_v50, %v1635_v63  ;;  %v1642_v27 = vsub.f32 %v1640_v60, %v1641_v2  ;;  %v2124_v4 = vand.u32 4294901760, %v2123_v13  ;;  %v2119_v33 = vsub.f32 %v2117_v56, %v2118_v24 }
 0x5b5   :  { %1721 = vmatprep.subr.mxu0 %v1634_v50  ;;  %v2130_v32 = vand.u32 4294901760, %v2129_v18  ;;  %v2136_v59 = vand.u32 4294901760, %v2135_v22 }
 0x5b6   :  { %1724 = vmatpush1.msra.mxu0 %v1640_v60  ;;  %v1637_v6 = vand.u32 4294901760, %v1636_v21  ;;  %v1643_v7 = vand.u32 4294901760, %v1642_v27 }
 0x5b7   :  { %1875 = vmatprep.subr.mxu0 %v1623_v35  ;;  %1760 = vmatmul.mubr.f32.vlgmr.msra.gmra.mxu0 %v3000_v17  ;;  %v2125_v35 = vsub.f32 %v2123_v13, %v2124_v4  ;;  %v2137_v46 = vsub.f32 %v2135_v22, %v2136_v59 }
 0x5b8   :  { %1879 = vmatpush1.msra.mxu0 %v1629_v39  ;;  %1638 = vmatprep.subr.mxu1 %v1637_v6  ;;  %v2131_v39 = vsub.f32 %v2129_v18, %v2130_v32 }
 0x5b9   :  { %1883 = vmatprep.subr.mxu0 %v1635_v63  ;;  %1644 = vmatpush1.msra.mxu1 %v1643_v7  ;;  %v2126_v47 = vand.u32 4294901760, %v2125_v35 }
 0x5ba   :  { %1887 = vmatpush1.msra.mxu0 %v1641_v2  ;;  %2796 = vmatmul.mubr.msk.f32.vlgmr.msra.gmra.mxu1 %vm3640_vm4, %v2903_v62  ;;  %vm3644_vm4 = vmmov %vm3641_vm0 }
 0x5bb   :  { %1795 = vmatprep.subr.mxu1 %v3363_v14  ;;  %1920 = vmatprep.mubr.f32.mxu0 %v2900_v3 }
 0x5bc   :  { %2037 = vmatprep.subr.mxu0 %v3400_v1  ;;  %1797 = vmatpush1.msra.mxu1 %v3366_v15 }
 0x5bd   :  { %2797 = vmatmul.mubr.msk.f32.vlgmr.msra.gmra.mxu0 %vm3641_vm0, %v2903_v62  ;;  %1799 = vmatprep.subr.mxu1 %v3379_v43 }
 0x5be   :  { %2039 = vmatpush1.msra.mxu0 %v3402_v55  ;;  %1801 = vmatpush1.msra.mxu1 %v3382_v31 }
 0x5bf   :  { %2041 = vmatprep.subr.mxu0 %v3405_v51  ;;  %1834 = vmatprep.mubr.f32.mxu1 %v2900_v3 }
 0x5c0   :  { %2043 = vmatpush1.msra.mxu0 %v3407_v10  ;;  %1838 = vmatmul.mubr.f32.vlgmr.msra.gmra.mxu1 %v3008_v26 }
 0x5c1   :  { %1957 = vmatprep.subr.mxu1 %v3363_v14  ;;  %2076 = vmatprep.mubr.f32.mxu0 %v2900_v3  ;;  %v2120_v14 = vand.u32 4294901760, %v2119_v33 }
 0x5c2   :  { %2210 = vmatprep.subr.mxu0 %v2117_v56  ;;  %1959 = vmatpush1.msra.mxu1 %v3366_v15  ;;  %v2138_v15 = vand.u32 4294901760, %v2137_v46 }
 0x5c3   :  { %2082 = vmatmul.mubr.f32.vlgmr.msra.gmra.mxu0 %v3036_v41  ;;  %1961 = vmatprep.subr.mxu1 %v3379_v43  ;;  %v2132_v41 = vand.u32 4294901760, %v2131_v39 }
 0x5c4   :  { %2213 = vmatpush1.msra.mxu0 %v2123_v13  ;;  %1963 = vmatpush1.msra.mxu1 %v3382_v31 }
 0x5c5   :  { %2216 = vmatprep.subr.mxu0 %v2129_v18  ;;  %1996 = vmatprep.mubr.f32.mxu1 %v2900_v3 }
 0x5c6   :  { %2219 = vmatpush1.msra.mxu0 %v2135_v22  ;;  %2798 = vmatmul.mubr.msk.f32.vlgmr.msra.gmra.mxu1 %vm3642_vm12, %v2903_v62  ;;  %vm3645_vm12 = vcmask 1040384  }
 0x5c7   :  { %2121 = vmatprep.subr.mxu1 %v2120_v14  ;;  %2252 = vmatprep.mubr.f32.mxu0 %v2900_v3 }
 0x5c8   :  { %2370 = vmatprep.subr.mxu0 %v2118_v24  ;;  %2127 = vmatpush1.msra.mxu1 %v2126_v47 }
 0x5c9   :  { %2255 = vmatmul.mubr.f32.vlgmr.msra.gmra.mxu0 %v3000_v17  ;;  %2133 = vmatprep.subr.mxu1 %v2132_v41 }
 0x5ca   :  { %2374 = vmatpush1.msra.mxu0 %v2124_v4  ;;  %2139 = vmatpush1.msra.mxu1 %v2138_v15 }
 0x5cb   :  { %2378 = vmatprep.subr.mxu0 %v2130_v32  ;;  %2172 = vmatprep.mubr.f32.mxu1 %v2900_v3 }
 0x5cc   :  { %2382 = vmatpush1.msra.mxu0 %v2136_v59  ;;  %2799 = vmatmul.mubr.msk.f32.vlgmr.msra.gmra.mxu1 %vm3643_vm15, %v2903_v62  ;;  %vm3646_vm15 = vmmov %vm3645_vm12 }
 0x5cd   :  { %2290 = vmatprep.subr.mxu1 %v3400_v1  ;;  %2329 = vmatprep.mubr.f32.mxu1 %v2900_v3 }
 0x5ce   :  { %2292 = vmatpush1.msra.mxu1 %v3402_v55  ;;  %2415 = vmatprep.mubr.f32.mxu0 %v2900_v3 }
 0x5cf   :  { %2294 = vmatprep.subr.mxu1 %v3405_v51  ;;  %2800 = vmatmul.mubr.msk.f32.vlgmr.msra.gmra.mxu0 %vm3644_vm4, %v2903_v62  ;;  %vm3647_vm4 = vcmp.lt.s32.totalorder %v3126_v23, 1 }
 0x5d0   :  { %2296 = vmatpush1.msra.mxu1 %v3407_v10  ;;  %2731 = vmatprep.mubr.f32.mxu0 %v2900_v3 }
 0x5d1   :  { %2333 = vmatmul.mubr.f32.vlgmr.msra.gmra.mxu1 %v3008_v26  ;;  %2452 = vmatprep.subr.mxu1 %v3400_v1 }
 0x5d2   :  { %2454 = vmatpush1.msra.mxu1 %v3402_v55  ;;  %2491 = vmatprep.mubr.f32.mxu1 %v2900_v3 }
 0x5d3   :  { %2456 = vmatprep.subr.mxu1 %v3405_v51 }
 0x5d4   :  { %2458 = vmatpush1.msra.mxu1 %v3407_v10 }
 0x5d5   :  { %2801 = vmatmul.mubr.msk.f32.vlgmr.msra.gmra.mxu1 %vm3641_vm0, %v2903_v62  ;;  %vm3648_vm0 = vmmov %vm3647_vm4 }
 0x673   :  { %v1588_v17 = vpop.f32.mrf.mxu0 }
 0x675   :  { %v1590_v43 = vpop.f32.mrf.mxu0 }
 0x677   :  { %v1761_v31 = vpop.f32.mrf.mxu0 }
 0x679   :  { %v1763_v36 = vpop.f32.mrf.mxu0 }
 0x67a   :  { %v1680_v49 = vpop.f32.mrf.mxu1 }
 0x67b   :  { %v1681_v21 = vadd.f32 %v1680_v49, %v1588_v17 }
 0x67c   :  { %v1682_v50 = vpop.f32.mrf.mxu1 }
 0x67d   :  { %v1923_v26 = vpop.f32.mrf.mxu0  ;;  %v1683_v1 = vadd.f32 %v1682_v50, %v1590_v43  ;;  %v1762_v6 = vadd.f32 %v1761_v31, %v1681_v21 }
 0x67f   :  { %v1925_v60 = vpop.f32.mrf.mxu0  ;;  %v1764_v51 = vadd.f32 %v1763_v36, %v1683_v1 }
 0x680   :  { %v1839_v61 = vpop.f32.mrf.mxu1 }
 0x681   :  { %v1840_v18 = vadd.f32 %v1839_v61, %v1762_v6 }
 0x682   :  { %v1841_v63 = vpop.f32.mrf.mxu1 }
 0x683   :  { %v2083_v2 = vpop.f32.mrf.mxu0  ;;  %v1842_v32 = vadd.f32 %v1841_v63, %v1764_v51  ;;  %v1924_v35 = vadd.f32 %v1923_v26, %v1840_v18 }
 0x685   :  { %v2085_v8 = vpop.f32.mrf.mxu0  ;;  %v1926_v41 = vadd.f32 %v1925_v60, %v1842_v32 }
 0x686   :  { %v1999_v0 = vpop.f32.mrf.mxu1 }
 0x687   :  { %v2000_v31 = vadd.f32 %v1999_v0, %v1924_v35 }
 0x688   :  { %v2001_v27 = vpop.f32.mrf.mxu1 }
 0x689   :  { %v2256_v48 = vpop.f32.mrf.mxu0  ;;  %v2002_v50 = vadd.f32 %v2001_v27, %v1926_v41 }
 0x68b   :  { %v2258_v55 = vpop.f32.mrf.mxu0 }
 0x68c   :  { %v2175_v7 = vpop.f32.mrf.mxu1 }
 0x68d   :  { %v2176_v62 = vadd.f32 %v2175_v7, %v2083_v2 }
 0x68e   :  { %v2177_v10 = vpop.f32.mrf.mxu1 }
 0x68f   :  { %v2257_v56 = vadd.f32 %v2256_v48, %v2176_v62  ;;  %v2178_v13 = vadd.f32 %v2177_v10, %v2085_v8  ;;  %v2418_v4 = vpop.f32.mrf.mxu0 }
 0x691   :  { %v2259_v22 = vadd.f32 %v2258_v55, %v2178_v13  ;;  %v2334_v24 = vpop.f32.mrf.mxu1  ;;  %v2420_v14 = vpop.f32.mrf.mxu0 }
 0x692   :  { %v2335_v59 = vadd.f32 %v2334_v24, %v2257_v56 }
 0x693   :  { %v2336_v33 = vpop.f32.mrf.mxu1 }
 0x694   :  { %v2419_v39 = vadd.f32 %v2418_v4, %v2335_v59  ;;  %v2337_v46 = vadd.f32 %v2336_v33, %v2259_v22 }
 0x695   :  { %v2494_v47 = vpop.f32.mrf.mxu1 }
 0x696   :  { %v2421_v15 = vadd.f32 %v2420_v14, %v2337_v46  ;;  %v2495_v17 = vadd.f32 %v2494_v47, %v2419_v39  ;;  %v2915_v14 = vmov 4  }
 0x697   :  { %v2496_v43 = vpop.f32.mrf.mxu1  ;;  %2837 = vset.pattern.permute.xlu1 %v2915_v14  ;;  %2838 = vset.pattern.permute.xlu0 %v2915_v14 }
 0x698   :  { %v2501_v36 = vrot.slane %v2495_v17, 7  ;;  %v2497_v49 = vadd.f32 %v2496_v43, %v2421_v15 }
 0x69a   :  { %v2502_v61 = vrot.slane %v2497_v49, 7  ;;  %v2505_v2 = vsel %vm3645_vm12, %v2000_v31, %v2501_v36  ;;  %vm3649_vm12 = vcmp.lt.s32.totalorder %v3126_v23, 2 }
 0x69b   :  { %2507 = vrot.lane.b32.xlu1 %v2505_v2, %s2904_s2 }
 0x69c   :  { %v2506_v63 = vsel %vm3646_vm15, %v2002_v50, %v2502_v61  ;;  %vm3650_vm15 = vmmov %vm3649_vm12 }
 0x69d   :  { %2509 = vrot.lane.b32.xlu0 %v2506_v63, %s2904_s2 }
 0x70d   :  { %v2508_v26 = vpop.permute.xlu1 %2507 }
 0x70f   :  { %v2510_v8 = vpop.permute.xlu0 %2509 }
 0x710   :  { %v2511_v60 = vsel %vm3647_vm4, %v2508_v26, %v2510_v8  ;;  %v2512_v0 = vsel %vm3648_vm0, %v2510_v8, %v2508_v26  ;;  %v2852_v26 = vld [vmem:[%s3588_s3 + $0x8] sm:$0xff]  ;;  %v2853_v8 = vld [vmem:[%s3588_s3] sm:$0xff]  ;;  %vm3663_vm4 = vcmask 130048  }
 0x711   :  { %v2513_v21 = vsel %vm3131_vm9, %v2512_v0, 0.0  ;;  %v2514_v27 = vsel %vm3135_vm10, %v2511_v60, 0.0  ;;  %vm3651_vm9 = vcmp.lt.s32.totalorder %v3126_v23, 4  ;;  %v43_v60 = vld [vmem:[%s3591_s6 + $0x8] sm:$0xff]  ;;  %v44_v0 = vld [vmem:[%s3591_s6 + $0x10] sm:$0xff]  ;;  %vm3664_vm0 = vmmov %vm3663_vm4 }
 0x712   :  { %v2515_v48 = vadd.f32 %v2513_v21, %v2505_v2  ;;  %v2516_v1 = vadd.f32 %v2514_v27, %v2506_v63  ;;  %vm3652_vm10 = vmmov %vm3651_vm9 }
 0x714   :  { %2517 = vrot.lane.b32.xlu1 %v2515_v48, %s2905_s1  ;;  %2519 = vrot.lane.b32.xlu0 %v2516_v1, %s2905_s1  ;;  %s2764_s1 = sshll.u32 %s2917_s18, 4  ;;  %s2765_s1 = int_to_ptr.vmem [resolvable:$true] %s2764_s1 }
 0x715   :  { %s2856_s25 = scalar_lea.vmem %s2765_s1, 256  ;;  %p2861_p1 = scmp.lt.s32.totalorder %s2765_s1, %s2765_s1 }
 0x716   :  { %p2857_p0 = scmp.ne.s32.totalorder %s2765_s1, %s2856_s25  ;;  %p2862_p2 = scmp.lt.s32.totalorder %s2856_s25, %s2856_s25 }
 0x718   :  { %p2863_p3 = por %p2862_p2, %p2861_p1 }
 0x71a   :  { %p2864_p4 = pnand %p2863_p3, %p2857_p0 }
 0x786   :  { %v2518_v6 = vpop.permute.xlu1 %2517  ;;  %v2520_v7 = vpop.permute.xlu0 %2519 }
 0x787   :  { %v2521_v62 = vsel %vm3649_vm12, %v2518_v6, %v2520_v7  ;;  %v2522_v55 = vsel %vm3650_vm15, %v2520_v7, %v2518_v6  ;;  %vm3665_vm12 = vmmov %vm3664_vm0 }
 0x788   :  { %v2523_v28 = vsel %vm3154_vm13, %v2522_v55, 0.0  ;;  %v2524_v29 = vsel %vm3158_vm14, %v2521_v62, 0.0  ;;  %vm3653_vm13 = vcmp.lt.s32.totalorder %v3126_v23, 8 }
 0x789   :  { %v2525_v51 = vadd.f32 %v2523_v28, %v2515_v48  ;;  %v2526_v10 = vadd.f32 %v2524_v29, %v2516_v1  ;;  %vm3654_vm14 = vmmov %vm3653_vm13 }
 0x78b   :  { %2527 = vrot.lane.b32.xlu1 %v2525_v51, %s2906_s19  ;;  %2529 = vrot.lane.b32.xlu0 %v2526_v10, %s2906_s19 }
 0x7fd   :  { %v2528_v56 = vpop.permute.xlu1 %2527  ;;  %v2530_v13 = vpop.permute.xlu0 %2529 }
 0x7fe   :  { %v2531_v18 = vsel %vm3651_vm9, %v2528_v56, %v2530_v13  ;;  %v2532_v22 = vsel %vm3652_vm10, %v2530_v13, %v2528_v56 }
 0x7ff   :  { %v2533_v44 = vsel %vm3177_vm2, %v2532_v22, 0.0  ;;  %v2534_v45 = vsel %vm3181_vm3, %v2531_v18, 0.0  ;;  %vm3655_vm2 = vcmp.lt.s32.totalorder %v3126_v23, 16 }
 0x800   :  { %v2535_v24 = vadd.f32 %v2533_v44, %v2525_v51  ;;  %v2536_v4 = vadd.f32 %v2534_v45, %v2526_v10  ;;  %vm3656_vm3 = vmmov %vm3655_vm2 }
 0x802   :  { %2537 = vrot.lane.b32.xlu1 %v2535_v24, %s2907_s20  ;;  %2539 = vrot.lane.b32.xlu0 %v2536_v4, %s2907_s20 }
 0x874   :  { %v2538_v32 = vpop.permute.xlu1 %2537  ;;  %v2540_v59 = vpop.permute.xlu0 %2539 }
 0x875   :  { %v2541_v33 = vsel %vm3653_vm13, %v2538_v32, %v2540_v59  ;;  %v2542_v35 = vsel %vm3654_vm14, %v2540_v59, %v2538_v32 }
 0x876   :  { %v2543_v57 = vsel %vm3200_vm7, %v2542_v35, 0.0  ;;  %v2544_v58 = vsel %vm3204_vm11, %v2541_v33, 0.0  ;;  %vm3657_vm7 = vcmp.lt.s32.totalorder %v3126_v23, 32 }
 0x877   :  { %v2545_v39 = vadd.f32 %v2543_v57, %v2535_v24  ;;  %v2546_v46 = vadd.f32 %v2544_v58, %v2536_v4  ;;  %vm3658_vm11 = vmmov %vm3657_vm7 }
 0x879   :  { %2547 = vrot.lane.b32.xlu1 %v2545_v39, %s2908_s21  ;;  %2549 = vrot.lane.b32.xlu0 %v2546_v46, %s2908_s21 }
 0x8eb   :  { %v2548_v47 = vpop.permute.xlu1 %2547  ;;  %v2550_v41 = vpop.permute.xlu0 %2549 }
 0x8ec   :  { %v2551_v15 = vsel %vm3655_vm2, %v2548_v47, %v2550_v41  ;;  %v2552_v11 = vsel %vm3656_vm3, %v2550_v41, %v2548_v47 }
 0x8ed   :  { %v2553_v12 = vsel %vm3223_vm5, %v2552_v11, 0.0  ;;  %v2554_v17 = vsel %vm3227_vm8, %v2551_v15, 0.0  ;;  %vm3661_vm8 = vnez %v3630_v25  ;;  %vm3662_vm5 = vnez %v3632_v30 }
 0x8ee   :  { %v2555_v43 = vadd.f32 %v2553_v12, %v2545_v39  ;;  %v2556_v31 = vadd.f32 %v2554_v17, %v2546_v46 }
 0x8f0   :  { %2557 = vrot.lane.b32.xlu1 %v2555_v43, %s2910_s22  ;;  %2559 = vrot.lane.b32.xlu0 %v2556_v31, %s2910_s22 }
 0x962   :  { %v2558_v36 = vpop.permute.xlu1 %2557  ;;  %v2560_v49 = vpop.permute.xlu0 %2559 }
 0x963   :  { %v2561_v50 = vsel %vm3657_vm7, %v2558_v36, %v2560_v49  ;;  %v2562_v61 = vsel %vm3658_vm11, %v2560_v49, %v2558_v36 }
 0x964   :  { %v2563_v37 = vsel %vm3246_vm6, %v2562_v61, 0.0  ;;  %v2564_v38 = vsel %vm3250_vm1, %v2561_v50, 0.0  ;;  %vm3659_vm1 = vcmp.lt.s32.totalorder %v3126_v23, 64 }
 0x965   :  { %v2565_v2 = vadd.f32 %v2563_v37, %v2555_v43  ;;  %v2566_v63 = vadd.f32 %v2564_v38, %v2556_v31  ;;  %vm3660_vm6 = vmmov %vm3659_vm1  ;;  %v41_v31 = vld [vmem:[%s3590_s5 + $0x10] sm:$0xff] }
 0x967   :  { %2567 = vrot.lane.b32.xlu1 %v2565_v2, %s2911_s23  ;;  %2569 = vrot.lane.b32.xlu0 %v2566_v63, %s2911_s23 }
 0x96b   :  { %2624 = vperm.xlu1 %2837, %v2852_v26   ;;  %2620 = vperm.xlu0 %2838, %v2853_v8  }
 0x96f   :  { %2839 = vset.pattern.permute.xlu1 %v2916_v53  ;;  %2840 = vset.pattern.permute.xlu0 %v2901_v5 }
 0x970   :  { %2636 = vperm.xlu1 %2839, %v2852_v26   ;;  %2645 = vperm.xlu0 %2840, %v42_v54  }
 0x974   :  { %2632 = vperm.xlu1 %2839, %v2853_v8   ;;  %v2855_v8 = vld [vmem:[%s3585_s0 + $0x8] sm:$0xff] }
 0x978   :  { %2841 = vset.pattern.permute.xlu1 %v2901_v5 }
 0x979   :  { %2650 = vperm.xlu1 %2841, %v43_v60  }
 0x97d   :  { %2655 = vperm.xlu1 %2841, %v44_v0  }
 0x9d9   :  { %v2568_v21 = vpop.permute.xlu1 %2567  ;;  %v2570_v27 = vpop.permute.xlu0 %2569 }
 0x9da   :  { %v2571_v5 = vsel %vm3659_vm1, %v2568_v21, %v2570_v27  ;;  %v2572_v48 = vsel %vm3660_vm6, %v2570_v27, %v2568_v21 }
 0x9db   :  { %v2573_v1 = vsel %vm3661_vm8, %v2572_v48, 0.0  ;;  %v2574_v6 = vsel %vm3662_vm5, %v2571_v5, 0.0 }
 0x9dc   :  { %v2575_v7 = vadd.f32 %v2573_v1, %v2565_v2  ;;  %v2576_v62 = vadd.f32 %v2574_v6, %v2566_v63  ;;  %v2854_v2 = vld [vmem:[%s3585_s0] sm:$0xff] }
 0x9de   :  { %v2577_v55 = vmul.f32 %v2575_v7, %v3294_v16  ;;  %v2578_v28 = vmul.f32 %v2576_v62, %v3297_v34 }
 0x9e0   :  { %v2579_v29 = vmul.f32 %v2577_v55, %v2577_v55  ;;  %v2580_v51 = vmul.f32 %v2578_v28, %v2578_v28  ;;  %v2598_v45 = vrot.slane %v2577_v55, %v3121_v19  ;;  %v2602_v24 = vrot.slane %v2578_v28, %v3121_v19 }
 0x9e2   :  { %v2583_v10 = vrot.slane %v2579_v29, 7  ;;  %v2584_v56 = vrot.slane %v2580_v51, 7  ;;  %v2605_v34 = vsub.f32 %v3354_v9, %v2598_v45  ;;  %v2603_v59 = vsub.f32 %v3374_v40, %v2598_v45 }
 0x9e3   :  { %v2606_v33 = vsub.f32 %v3356_v52, %v2602_v24  ;;  %v2604_v57 = vsub.f32 %v3376_v42, %v2602_v24  ;;  %v40_v42 = vld [vmem:[%s3590_s5 + $0x8] sm:$0xff] }
 0x9e4   :  { %v2587_v13 = vsub.f32 %v2577_v55, %v2583_v10  ;;  %v2588_v18 = vsub.f32 %v2578_v28, %v2584_v56 }
 0x9e6   :  { %v2589_v23 = vmax.f32 %v2587_v13, 0.0  ;;  %v2590_v22 = vmax.f32 %v2588_v18, 0.0  ;;  %v2625_v30 = vpop.permute.xlu1 %2624  ;;  %v2621_v14 = vpop.permute.xlu0 %2620 }
 0x9e8   :  { %v2591_v44 = vadd.f32 1e-10, %v2589_v23  ;;  %v2592_v25 = vadd.f32 1e-10, %v2590_v22 }
 0x9ea   :  { %2848 = vrsqrt.f32 %v2591_v44 }
 0x9eb   :  { %2850 = vrsqrt.f32 %v2592_v25  ;;  %v2637_v39 = vpop.permute.xlu1 %2636  ;;  %v2646_v36 = vpop.permute.xlu0 %2645 }
 0x9ef   :  { %v2633_v43 = vpop.permute.xlu1 %2632 }
 0x9f4   :  { %v2651_v37 = vpop.permute.xlu1 %2650 }
 0x9f7   :  { %v2849_v16 = vpop.eup %2848 }
 0x9f8   :  { %v2851_v4 = vpop.eup %2850  ;;  %v2610_v32 = vrot.slane %v2849_v16, %v3123_v20  ;;  %v2656_v0 = vpop.permute.xlu1 %2655 }
 0x9f9   :  { %v2614_v35 = vrot.slane %v2851_v4, %v3123_v20  ;;  %v39_v20 = vld [vmem:[%s3590_s5] sm:$0xff]  ;;  %s2918_s5 = smov [#allocation4]  }
 0x9fa   :  { %v2617_v58 = vmul.f32 %v2610_v32, %v2605_v34  ;;  %v2615_v46 = vmul.f32 %v2610_v32, %v2603_v59  ;;  %s2773_s24 = sshll.u32 %s2918_s5, 4  ;;  %s2774_s24 = int_to_ptr.vmem [resolvable:$true] %s2773_s24 }
 0x9fb   :  { %v2618_v47 = vmul.f32 %v2614_v35, %v2606_v33  ;;  %v2616_v19 = vmul.f32 %v2614_v35, %v2604_v57 }
 0x9fc   :  { %v2629_v41 = vmul.f32 %v2625_v30, %v2617_v58  ;;  %v2627_v12 = vmul.f32 %v2621_v14, %v2615_v46 }
 0x9fd   :  { %v2630_v15 = vmul.f32 %v2625_v30, %v2618_v47  ;;  %v2628_v11 = vmul.f32 %v2621_v14, %v2616_v19 }
 0x9fe   :  { %v2641_v9 = vadd.f32 %v2637_v39, %v2629_v41  ;;  %v2639_v52 = vadd.f32 %v2633_v43, %v2627_v12 }
 0x9ff   :  { %v2642_v17 = vadd.f32 %v2637_v39, %v2630_v15  ;;  %v2640_v40 = vadd.f32 %v2633_v43, %v2628_v11 }
 0xa01   :  { %2695 = vmatprep.subr.mxu0 %v2642_v17 }
 0xa02   :  { %2696 = vmatpush1.msra.mxu0 %v2641_v9 }
 0xa03   :  { %2697 = vmatprep.subr.mxu0 %v2640_v40 }
 0xa04   :  { %2698 = vmatpush1.msra.mxu0 %v2639_v52 }
 0xa05   :  { %2802 = vmatmul.mubr.msk.f32.vlgmr.msra.gmra.mxu0 %vm3663_vm4, %v39_v20 }
 0xa06   :  { %2737 = vmatprep.mubr.f32.mxu0 %v2900_v3 }
 0xa09   :  { %2803 = vmatmul.mubr.msk.f32.gmra.mxu0 %vm3664_vm0, %v40_v42 }
 0xa0a   :  { %2743 = vmatprep.mubr.f32.mxu0 %v2900_v3 }
 0xa0d   :  { %2804 = vmatmul.mubr.msk.f32.gmra.mxu0 %vm3665_vm12, %v41_v31 }
 0xac5   :  { %v2733_v49 = vpop.f32.mrf.mxu0 }
 0xac6   :  { %v2734_v50 = vadd.f32 %v2733_v49, %v2646_v36 }
 0xac7   :  { %v2735_v61 = vpop.f32.mrf.mxu0 }
 0xac8   :  { %v2736_v38 = vadd.f32 %v2735_v61, %v2646_v36  ;;  %v2750_v63 = vadd.f32 %v2854_v2, %v2734_v50 }
 0xac9   :  { %v2739_v3 = vpop.f32.mrf.mxu0 }
 0xaca   :  { %v2740_v26 = vadd.f32 %v2739_v3, %v2651_v37  ;;  %v2751_v53 = vadd.f32 %v2855_v8, %v2736_v38  ;;  %2752 = vst [vmem:[#allocation2] sm:$0xff] %v2750_v63 }
 0xacb   :  { %v2741_v54 = vpop.f32.mrf.mxu0 }
 0xacc   :  { %2754 = vst [vmem:[#allocation4] sm:$0xff] %v2740_v26  ;;  %v2742_v60 = vadd.f32 %v2741_v54, %v2651_v37  ;;  %2753 = vst [vmem:[#allocation2 + $0x8] sm:$0xff] %v2751_v53 }
 0xacd   :  { %v2745_v21 = vpop.f32.mrf.mxu0 }
 0xace   :  { %2867 = shalt.err (!%p2864_p4)
}
 0xacf   :  { %2767 = dma.vmem_to_hbm [thread:$0]  %s2765_s1, 256, %s3592_s7, [#allocation3]   ;;  %2755 = vst [vmem:[#allocation4 + $0x8] sm:$0xff] %v2742_v60  ;;  %v2746_v27 = vadd.f32 %v2745_v21, %v2656_v0  ;;  %v2747_v5 = vpop.f32.mrf.mxu0 }
 0xad0   :  { %v2748_v48 = vadd.f32 %v2747_v5, %v2656_v0  ;;  %s2876_s27 = scalar_lea.vmem %s2774_s24, 512  ;;  %p2881_p6 = scmp.lt.s32.totalorder %s2774_s24, %s2774_s24 }
 0xad1   :  { %2756 = vst [vmem:[#allocation4 + $0x10] sm:$0xff] %v2746_v27  ;;  %p2877_p5 = scmp.ne.s32.totalorder %s2774_s24, %s2876_s27  ;;  %p2882_p7 = scmp.lt.s32.totalorder %s2876_s27, %s2876_s27 }
 0xad2   :  { %2757 = vst [vmem:[#allocation4 + $0x18] sm:$0xff] %v2748_v48 }
 0xad3   :  { %p2883_p8 = por %p2882_p7, %p2881_p6 }
 0xad5   :  { %p2884_p9 = pnand %p2883_p8, %p2877_p5 }
 0xad7   :  { %2887 = shalt.err (!%p2884_p9)
}
 0xad8   :  { %s2919_s4 = smov 256  }
 0xad9   :  { %2779 = dma.vmem_to_hbm [thread:$0]  %s2774_s24, 512, %s3593_s8, [#allocation5], %s2919_s4, %s2919_s4, %s2908_s21  }
 0xada   :  { %2896 = dma.done.wait [#allocation3], 256  }
 0xadb   :  { %2897 = vsyncadd [#allocation3], 4294967040 }
 0xadc   :  { %2898 = dma.done.wait [#allocation5], 512  }
 0xadd   :  { %2899 = vsyncadd [#allocation5], 4294966784 }
 0xade   :  { %2786 = vsyncpa [#allocation3], 1 }
 0xadf   :  { %2787 = vsyncpa [#allocation5], 1 }

</bundles_post_ra>
